<compile_context>
chip_gen: v7x
topology: tpu7x:2x2x1
jax: 0.10.0
libtpu: 0.0.40
codegen_flags: <defaults>
</compile_context>

<pallas_src>
import math

import jax
import jax.numpy as jnp
from jax.experimental import pallas as pl
from jax.experimental.pallas import tpu as pltpu

# ----- small, CLIP-shaped synthetic config -----
B = 2            # batch (number of prompts)
S = 8            # sequence length (context length)
D = 32           # transformer width
H = 4            # attention heads
HD = D // H      # head dim
HIDDEN = 4 * D   # MLP hidden
L = 2            # transformer layers
P = 16           # text projection dim
EPS = 1e-5       # LayerNorm eps (PyTorch default)
DTYPE = jnp.float32        # clip_model.dtype modeled as fp32
MXU_DTYPE = jnp.bfloat16   # matmul-operand dtype (MXU native); stats stay f32
BS = B * S


def _normalize(x):
    """LayerNorm without affine (affine folded into adjacent weights)."""
    mu = jnp.mean(x, axis=-1, keepdims=True)
    var = jnp.mean(jnp.square(x - mu), axis=-1, keepdims=True)
    return (x - mu) * jax.lax.rsqrt(var + EPS)


def _layer_norm(x, w, b):
    """Full LayerNorm (reference only)."""
    return _normalize(x) * w + b


# --------------------------------------------------------------------------
# Fused kernel: positional add -> L residual attention blocks -> ln_final
#               -> EOT gather -> text_projection.   grid = () (single call).
# --------------------------------------------------------------------------
def _text_encoder_kernel(eot_ref,                                    # (B,1,1) i32
                         prompts_ref, pos_ref,
                         wqkv_ref, bqkv_ref, wo_ref, bo_ref,
                         w1_ref, b1_ref, w2_ref, b2_ref,
                         projw_ref, projb_ref,
                         out_ref):
    # x = prompts + positional_embedding ; flatten (B,S,D) -> (B*S, D) so every
    # dense matmul runs over all rows at once.  (The PyTorch permute(1,0,2)
    # pair is a layout no-op here.)  Residual stream stays f32.
    x = (prompts_ref[...] + pos_ref[...]).reshape(BS, D).astype(jnp.float32)

    # causal mask, shared by every layer / head / batch element
    rows = jax.lax.broadcasted_iota(jnp.int32, (S, S), 0)
    cols = jax.lax.broadcasted_iota(jnp.int32, (S, S), 1)
    causal = jnp.where(cols <= rows, 0.0, -1e9).astype(jnp.float32)   # (S, S)

    for li in range(L):                                   # static layer loop
        # ---- multi-head causal self-attention ----
        # ln1 affine + 1/sqrt(HD) already folded into wqkv/bqkv (host prep).
        qkv = jnp.dot(_normalize(x).astype(MXU_DTYPE), wqkv_ref[li],
                      preferred_element_type=jnp.float32) + bqkv_ref[li]   # (BS,3D) f32
        qkv3 = qkv.reshape(B, S, 3 * D)
        q3, k3, v3 = qkv3[..., :D], qkv3[..., D:2 * D], qkv3[..., 2 * D:]

        def _heads(t):  # (B,S,D) -> (H*B, S, HD), z = h*B + b
            return jnp.concatenate(
                [t[:, :, hh * HD:(hh + 1) * HD] for hh in range(H)], axis=0)

        qz = _heads(q3).astype(MXU_DTYPE)
        kz = _heads(k3).astype(MXU_DTYPE)
        vz = _heads(v3).astype(MXU_DTYPE)

        # single batched score matmul + single softmax over all (batch, head)
        s = jnp.einsum('zqe,zke->zqk', qz, kz,
                       preferred_element_type=jnp.float32) + causal        # (HB,S,S)
        s = s - jnp.max(s, axis=-1, keepdims=True)
        p = jnp.exp(s)
        inv = pl.reciprocal(jnp.sum(p, axis=-1, keepdims=True), approx=True)
        ctx = jnp.einsum('zqk,zke->zqe', p.astype(MXU_DTYPE), vz,
                         preferred_element_type=jnp.float32) * inv          # (HB,S,HD)

        # head merge back into lanes, then output projection
        attn = jnp.concatenate([ctx[hh * B:(hh + 1) * B] for hh in range(H)],
                               axis=-1).reshape(BS, D)
        x = x + jnp.dot(attn.astype(MXU_DTYPE), wo_ref[li],
                        preferred_element_type=jnp.float32) + bo_ref[li]

        # ---- MLP with QuickGELU (CLIP); ln2 affine folded into w1/b1 ----
        m = jnp.dot(_normalize(x).astype(MXU_DTYPE), w1_ref[li],
                    preferred_element_type=jnp.float32) + b1_ref[li]
        m = m * jax.nn.sigmoid(1.702 * m)
        x = x + jnp.dot(m.astype(MXU_DTYPE), w2_ref[li],
                        preferred_element_type=jnp.float32) + b2_ref[li]

    # ---- EOT gather: in-register one-hot mask-reduce (no VMEM scratch) ----
    x3 = x.reshape(B, S, D)
    pos3 = jax.lax.broadcasted_iota(jnp.int32, (B, S, D), 1)
    onehot = (pos3 == eot_ref[...]).astype(jnp.float32)        # (B,S,D)
    eot_x = jnp.sum(onehot * x3, axis=1)                       # (B, D)

    # ln_final affine folded into projw / projb (host prep)
    out_ref[...] = (jnp.dot(_normalize(eot_x).astype(MXU_DTYPE), projw_ref[...],
                            preferred_element_type=jnp.float32)
                    + projb_ref[...]).astype(out_ref.dtype)


def _vmem():
    return pl.BlockSpec(memory_space=pltpu.MemorySpace.VMEM)


@jax.jit
def text_encoder_forward(prompts, tokenized_prompts, kp):
    # EOT token index = argmax over token ids (glue, as in the PyTorch module).
    eot = jnp.argmax(tokenized_prompts, axis=-1).astype(jnp.int32).reshape(B, 1, 1)
    args = (eot, prompts, kp['pos'],
            kp['wqkv'], kp['bqkv'], kp['wo'], kp['bo'],
            kp['w1'], kp['b1'], kp['w2'], kp['b2'],
            kp['projw'], kp['projb'])
    return pl.pallas_call(
        _text_encoder_kernel,
        out_shape=jax.ShapeDtypeStruct((B, P), DTYPE),
        in_specs=[_vmem()] * len(args),
        out_specs=_vmem(),
    )(*args)


# --------------------------------------------------------------------------
# Host-side parameter prep (one-time, weights only):
#   * fold LN affines into the adjacent dense weights (exact algebra),
#   * fold 1/sqrt(HD) into the q columns of W_qkv / b_qkv,
#   * stack per-layer weights along a layer axis, store matmul weights in bf16.
# --------------------------------------------------------------------------
def prep_kernel_params(params):
    scale = 1.0 / math.sqrt(HD)

    def fold_ln(gamma, beta, w, b):
        # LN(x) @ w + b  ==  normalize(x) @ (gamma^T * w) + (beta @ w + b)
        return gamma.reshape(-1, 1) * w, beta @ w + b

    stk = {k: [] for k in ('wqkv', 'bqkv', 'wo', 'bo', 'w1', 'b1', 'w2', 'b2')}
    for ly in params['layers']:
        wqkv, bqkv = fold_ln(ly['ln1w'], ly['ln1b'], ly['wqkv'], ly['bqkv'])
        wqkv = wqkv.at[:, :D].multiply(scale)     # attention scale -> q block
        bqkv = bqkv.at[:, :D].multiply(scale)
        w1, b1 = fold_ln(ly['ln2w'], ly['ln2b'], ly['w1'], ly['b1'])
        stk['wqkv'].append(wqkv); stk['bqkv'].append(bqkv)
        stk['wo'].append(ly['wo']); stk['bo'].append(ly['bo'])
        stk['w1'].append(w1); stk['b1'].append(b1)
        stk['w2'].append(ly['w2']); stk['b2'].append(ly['b2'])

    projw = params['lnfw'].reshape(-1, 1) * params['proj']    # (D, P)
    projb = params['lnfb'] @ params['proj']                   # (1, P)

    st = lambda n: jnp.stack(stk[n])
    return {
        'pos': params['pos_emb'],
        'wqkv': st('wqkv').astype(MXU_DTYPE), 'bqkv': st('bqkv'),
        'wo':   st('wo').astype(MXU_DTYPE),   'bo':   st('bo'),
        'w1':   st('w1').astype(MXU_DTYPE),   'b1':   st('b1'),
        'w2':   st('w2').astype(MXU_DTYPE),   'b2':   st('b2'),
        'projw': projw.astype(MXU_DTYPE),     'projb': projb,
    }


# --------------------------------------------------------------------------
# Pure-JAX reference (mirrors the PyTorch semantics, uses the ORIGINAL
# unfolded / unstacked f32 params) for a correctness check.
# --------------------------------------------------------------------------
def reference_forward(prompts, tokenized_prompts, params):
    x = (prompts + params['pos_emb'][None]).astype(DTYPE)
    r = jnp.arange(S)
    mask = jnp.where(r[None, :] <= r[:, None], 0.0, -1e9).astype(jnp.float32)
    scale = 1.0 / (HD ** 0.5)
    for ly in params['layers']:
        h = _layer_norm(x, ly['ln1w'][0], ly['ln1b'][0])
        qkv = h @ ly['wqkv'] + ly['bqkv'][0]
        q, k, v = jnp.split(qkv, 3, axis=-1)
        sh = lambda t: t.reshape(B, S, H, HD).transpose(0, 2, 1, 3)
        q, k, v = sh(q), sh(k), sh(v)
        s = jnp.einsum('bhqd,bhkd->bhqk', q, k) * scale + mask
        p = jax.nn.softmax(s, axis=-1)
        a = jnp.einsum('bhqk,bhkd->bhqd', p, v).transpose(0, 2, 1, 3).reshape(B, S, D)
        x = x + a @ ly['wo'] + ly['bo'][0]
        h2 = _layer_norm(x, ly['ln2w'][0], ly['ln2b'][0])
        m = h2 @ ly['w1'] + ly['b1'][0]
        m = m * jax.nn.sigmoid(1.702 * m)
        x = x + m @ ly['w2'] + ly['b2'][0]
    xl = _layer_norm(x, params['lnfw'][0], params['lnfb'][0])
    eot = jnp.argmax(tokenized_prompts, axis=-1)
    return xl[jnp.arange(B), eot] @ params['proj']


# --------------------------------------------------------------------------
# Deterministic synthetic parameters (shapes implied by TextEncoder.__init__)
# --------------------------------------------------------------------------
def make_params(key):
    def nrm(k, shape, scale=0.02):
        return (scale * jax.random.normal(k, shape, jnp.float32)).astype(jnp.float32)

    keys = jax.random.split(key, 4 + L)
    params = {
        'pos_emb': nrm(keys[0], (S, D)),                       # positional_embedding
        'lnfw': (1.0 + nrm(keys[1], (1, D), 0.1)),             # ln_final.weight
        'lnfb': nrm(keys[2], (1, D), 0.1),                     # ln_final.bias
        'proj': nrm(keys[3], (D, P)),                          # text_projection
        'layers': [],
    }
    for li in range(L):
        ks = jax.random.split(keys[4 + li], 12)
        params['layers'].append({
            'ln1w': 1.0 + nrm(ks[0], (1, D), 0.1),
            'ln1b': nrm(ks[1], (1, D), 0.1),
            'wqkv': nrm(ks[2], (D, 3 * D)),
            'bqkv': nrm(ks[3], (1, 3 * D)),
            'wo':   nrm(ks[4], (D, D)),
            'bo':   nrm(ks[5], (1, D)),
            'ln2w': 1.0 + nrm(ks[6], (1, D), 0.1),
            'ln2b': nrm(ks[7], (1, D), 0.1),
            'w1':   nrm(ks[8], (D, HIDDEN)),
            'b1':   nrm(ks[9], (1, HIDDEN)),
            'w2':   nrm(ks[10], (HIDDEN, D)),
            'b2':   nrm(ks[11], (1, D)),
        })
    return params


if __name__ == "__main__":
    root = jax.random.PRNGKey(0)
    k_prompt, k_tok, k_param = jax.random.split(root, 3)

    params = make_params(k_param)
    kparams = prep_kernel_params(params)

    # prompts: learned context embeddings already in transformer width (B, S, D)
    prompts = jax.random.normal(k_prompt, (B, S, D), jnp.float32).astype(DTYPE)
    # tokenized_prompts: token ids; put the (largest) EOT id at a known position
    tokenized_prompts = jax.random.randint(k_tok, (B, S), 1, 1000, jnp.int32)
    tokenized_prompts = tokenized_prompts.at[0, 5].set(49407)
    tokenized_prompts = tokenized_prompts.at[1, 3].set(49407)

    out = text_encoder_forward(prompts, tokenized_prompts, kparams)
    out = jax.block_until_ready(out)

    # Reference in full f32 precision.  The kernel now feeds the MXU bf16
    # operands (f32 accumulation), so agreement is bounded by bf16 operand
    # rounding (~1e-3 absolute here, output magnitude ~0.1); a genuinely broken
    # kernel would be off by ~0.1-0.3.
    with jax.default_matmul_precision("float32"):
        ref = reference_forward(prompts, tokenized_prompts, params)

    assert out.shape == (B, P), out.shape
    assert bool(jnp.all(jnp.isfinite(out)))
    err = float(jnp.max(jnp.abs(out - ref)))
    assert err < 2e-2, err

    # TODO(synk): real CLIP uses fp16; if adopted, keep LN stats, softmax
    # max/sum and matmul accumulators in f32 exactly as done here.
    print("KERNEL_OK")
</pallas_src>

<mosaic_0001>
module attributes {stable_mosaic.version = 11 : i64} {
  func.func @_text_encoder_kernel(%arg0: memref<2x1x1xi32, #tpu.memory_space<vmem>>, %arg1: memref<2x8x32xf32, #tpu.memory_space<vmem>>, %arg2: memref<8x32xf32, #tpu.memory_space<vmem>>, %arg3: memref<2x32x96xbf16, #tpu.memory_space<vmem>>, %arg4: memref<2x1x96xf32, #tpu.memory_space<vmem>>, %arg5: memref<2x32x32xbf16, #tpu.memory_space<vmem>>, %arg6: memref<2x1x32xf32, #tpu.memory_space<vmem>>, %arg7: memref<2x32x128xbf16, #tpu.memory_space<vmem>>, %arg8: memref<2x1x128xf32, #tpu.memory_space<vmem>>, %arg9: memref<2x128x32xbf16, #tpu.memory_space<vmem>>, %arg10: memref<2x1x32xf32, #tpu.memory_space<vmem>>, %arg11: memref<32x16xbf16, #tpu.memory_space<vmem>>, %arg12: memref<1x16xf32, #tpu.memory_space<vmem>>, %arg13: memref<2x16xf32, #tpu.memory_space<vmem>>) attributes {dimension_semantics = [], scalar_prefetch = 0 : i64, scratch_operands = 0 : i64, tpu.core_type = #tpu.core_type<tc>} {
    %c0 = arith.constant 0 : index
    %c0_0 = arith.constant 0 : index
    %c0_1 = arith.constant 0 : index
    %0 = vector.load %arg1[%c0, %c0_0, %c0_1] : memref<2x8x32xf32, #tpu.memory_space<vmem>>, vector<2x8x32xf32>
    %c0_2 = arith.constant 0 : index
    %c0_3 = arith.constant 0 : index
    %1 = vector.load %arg2[%c0_2, %c0_3] : memref<8x32xf32, #tpu.memory_space<vmem>>, vector<8x32xf32>
    %2 = vector.shape_cast %1 : vector<8x32xf32> to vector<1x8x32xf32>
    %3 = vector.broadcast %2 : vector<1x8x32xf32> to vector<2x8x32xf32>
    %4 = arith.addf %0, %3 : vector<2x8x32xf32>
    %5 = vector.shape_cast %4 : vector<2x8x32xf32> to vector<16x32xf32>
    %6 = tpu.iota {dimensions = array<i32: 0>} : vector<8x8xi32>
    %7 = tpu.iota {dimensions = array<i32: 1>} : vector<8x8xi32>
    %8 = arith.cmpi sle, %7, %6 : vector<8x8xi32>
    %cst = arith.constant 0.000000e+00 : f32
    %cst_4 = arith.constant -1.000000e+09 : f32
    %9 = vector.broadcast %cst : f32 to vector<8x8xf32>
    %10 = vector.broadcast %cst_4 : f32 to vector<8x8xf32>
    %11 = arith.select %8, %9, %10 : vector<8x8xi1>, vector<8x8xf32>
    %cst_5 = arith.constant dense<0.000000e+00> : vector<16xf32>
    %12 = vector.multi_reduction <add>, %5, %cst_5 [1] : vector<16x32xf32> to vector<16xf32>
    %13 = vector.shape_cast %12 : vector<16xf32> to vector<16x1xf32>
    %cst_6 = arith.constant 3.200000e+01 : f32
    %14 = vector.broadcast %cst_6 : f32 to vector<16x1xf32>
    %15 = arith.divf %13, %14 : vector<16x1xf32>
    %16 = vector.broadcast %15 : vector<16x1xf32> to vector<16x32xf32>
    %17 = arith.subf %5, %16 : vector<16x32xf32>
    %18 = arith.mulf %17, %17 : vector<16x32xf32>
    %cst_7 = arith.constant dense<0.000000e+00> : vector<16xf32>
    %19 = vector.multi_reduction <add>, %18, %cst_7 [1] : vector<16x32xf32> to vector<16xf32>
    %20 = vector.shape_cast %19 : vector<16xf32> to vector<16x1xf32>
    %cst_8 = arith.constant 3.200000e+01 : f32
    %21 = vector.broadcast %cst_8 : f32 to vector<16x1xf32>
    %22 = arith.divf %20, %21 : vector<16x1xf32>
    %23 = vector.broadcast %15 : vector<16x1xf32> to vector<16x32xf32>
    %24 = arith.subf %5, %23 : vector<16x32xf32>
    %cst_9 = arith.constant 9.99999974E-6 : f32
    %25 = vector.broadcast %cst_9 : f32 to vector<16x1xf32>
    %26 = arith.addf %22, %25 : vector<16x1xf32>
    %27 = math.rsqrt %26 : vector<16x1xf32>
    %28 = vector.broadcast %27 : vector<16x1xf32> to vector<16x32xf32>
    %29 = arith.mulf %24, %28 : vector<16x32xf32>
    %30 = arith.truncf %29 : vector<16x32xf32> to vector<16x32xbf16>
    %c0_10 = arith.constant 0 : index
    %c0_11 = arith.constant 0 : index
    %c0_12 = arith.constant 0 : index
    %31 = vector.load %arg3[%c0_10, %c0_11, %c0_12] : memref<2x32x96xbf16, #tpu.memory_space<vmem>>, vector<1x32x96xbf16>
    %32 = vector.shape_cast %31 : vector<1x32x96xbf16> to vector<32x96xbf16>
    %cst_13 = arith.constant dense<0.000000e+00> : vector<16x96xf32>
    %33 = tpu.matmul %30, %32, %cst_13 {dimension_numbers = #tpu.dot_dimension_numbers<[1], [0], [0], [1], [0, 0, 1, 1], [], []>} : vector<16x32xbf16>, vector<32x96xbf16>, vector<16x96xf32> -> vector<16x96xf32>
    %c0_14 = arith.constant 0 : index
    %c0_15 = arith.constant 0 : index
    %c0_16 = arith.constant 0 : index
    %34 = vector.load %arg4[%c0_14, %c0_15, %c0_16] : memref<2x1x96xf32, #tpu.memory_space<vmem>>, vector<1x1x96xf32>
    %35 = vector.shape_cast %34 : vector<1x1x96xf32> to vector<1x96xf32>
    %36 = vector.broadcast %35 : vector<1x96xf32> to vector<16x96xf32>
    %37 = arith.addf %33, %36 : vector<16x96xf32>
    %38 = vector.shape_cast %37 : vector<16x96xf32> to vector<2x8x96xf32>
    %39 = vector.extract_strided_slice %38 {offsets = [0, 0, 0], sizes = [2, 8, 32], strides = [1, 1, 1]} : vector<2x8x96xf32> to vector<2x8x32xf32>
    %40 = vector.extract_strided_slice %38 {offsets = [0, 0, 32], sizes = [2, 8, 32], strides = [1, 1, 1]} : vector<2x8x96xf32> to vector<2x8x32xf32>
    %41 = vector.extract_strided_slice %38 {offsets = [0, 0, 64], sizes = [2, 8, 32], strides = [1, 1, 1]} : vector<2x8x96xf32> to vector<2x8x32xf32>
    %42 = vector.extract_strided_slice %39 {offsets = [0, 0, 0], sizes = [2, 8, 8], strides = [1, 1, 1]} : vector<2x8x32xf32> to vector<2x8x8xf32>
    %43 = vector.extract_strided_slice %39 {offsets = [0, 0, 8], sizes = [2, 8, 8], strides = [1, 1, 1]} : vector<2x8x32xf32> to vector<2x8x8xf32>
    %44 = vector.extract_strided_slice %39 {offsets = [0, 0, 16], sizes = [2, 8, 8], strides = [1, 1, 1]} : vector<2x8x32xf32> to vector<2x8x8xf32>
    %45 = vector.extract_strided_slice %39 {offsets = [0, 0, 24], sizes = [2, 8, 8], strides = [1, 1, 1]} : vector<2x8x32xf32> to vector<2x8x8xf32>
    %46 = tpu.concatenate %42, %43, %44, %45 in 0 : vector<2x8x8xf32>, vector<2x8x8xf32>, vector<2x8x8xf32>, vector<2x8x8xf32> -> vector<8x8x8xf32>
    %47 = arith.truncf %46 : vector<8x8x8xf32> to vector<8x8x8xbf16>
    %48 = vector.extract_strided_slice %40 {offsets = [0, 0, 0], sizes = [2, 8, 8], strides = [1, 1, 1]} : vector<2x8x32xf32> to vector<2x8x8xf32>
    %49 = vector.extract_strided_slice %40 {offsets = [0, 0, 8], sizes = [2, 8, 8], strides = [1, 1, 1]} : vector<2x8x32xf32> to vector<2x8x8xf32>
    %50 = vector.extract_strided_slice %40 {offsets = [0, 0, 16], sizes = [2, 8, 8], strides = [1, 1, 1]} : vector<2x8x32xf32> to vector<2x8x8xf32>
    %51 = vector.extract_strided_slice %40 {offsets = [0, 0, 24], sizes = [2, 8, 8], strides = [1, 1, 1]} : vector<2x8x32xf32> to vector<2x8x8xf32>
    %52 = tpu.concatenate %48, %49, %50, %51 in 0 : vector<2x8x8xf32>, vector<2x8x8xf32>, vector<2x8x8xf32>, vector<2x8x8xf32> -> vector<8x8x8xf32>
    %53 = arith.truncf %52 : vector<8x8x8xf32> to vector<8x8x8xbf16>
    %54 = vector.extract_strided_slice %41 {offsets = [0, 0, 0], sizes = [2, 8, 8], strides = [1, 1, 1]} : vector<2x8x32xf32> to vector<2x8x8xf32>
    %55 = vector.extract_strided_slice %41 {offsets = [0, 0, 8], sizes = [2, 8, 8], strides = [1, 1, 1]} : vector<2x8x32xf32> to vector<2x8x8xf32>
    %56 = vector.extract_strided_slice %41 {offsets = [0, 0, 16], sizes = [2, 8, 8], strides = [1, 1, 1]} : vector<2x8x32xf32> to vector<2x8x8xf32>
    %57 = vector.extract_strided_slice %41 {offsets = [0, 0, 24], sizes = [2, 8, 8], strides = [1, 1, 1]} : vector<2x8x32xf32> to vector<2x8x8xf32>
    %58 = tpu.concatenate %54, %55, %56, %57 in 0 : vector<2x8x8xf32>, vector<2x8x8xf32>, vector<2x8x8xf32>, vector<2x8x8xf32> -> vector<8x8x8xf32>
    %59 = arith.truncf %58 : vector<8x8x8xf32> to vector<8x8x8xbf16>
    "tpu.trace_start"() <{level = 10 : i32, message = "zqe,zke->zqk"}> : () -> ()
    %cst_17 = arith.constant dense<0.000000e+00> : vector<8x8x8xf32>
    %60 = tpu.matmul %47, %53, %cst_17 {dimension_numbers = #tpu.dot_dimension_numbers<[2], [2], [1], [1], [0, 0, 0, 1, 1, 1], [0], [0]>} : vector<8x8x8xbf16>, vector<8x8x8xbf16>, vector<8x8x8xf32> -> vector<8x8x8xf32>
    "tpu.trace_stop"() : () -> ()
    %61 = vector.shape_cast %11 : vector<8x8xf32> to vector<1x8x8xf32>
    %62 = vector.broadcast %61 : vector<1x8x8xf32> to vector<8x8x8xf32>
    %63 = arith.addf %60, %62 : vector<8x8x8xf32>
    %cst_18 = arith.constant dense<0xFF800000> : vector<8x8xf32>
    %64 = vector.multi_reduction <maximumf>, %63, %cst_18 [2] : vector<8x8x8xf32> to vector<8x8xf32>
    %65 = vector.shape_cast %64 : vector<8x8xf32> to vector<8x8x1xf32>
    %66 = vector.broadcast %65 : vector<8x8x1xf32> to vector<8x8x8xf32>
    %67 = arith.subf %63, %66 : vector<8x8x8xf32>
    %68 = math.exp %67 : vector<8x8x8xf32>
    %cst_19 = arith.constant dense<0.000000e+00> : vector<8x8xf32>
    %69 = vector.multi_reduction <add>, %68, %cst_19 [2] : vector<8x8x8xf32> to vector<8x8xf32>
    %70 = vector.shape_cast %69 : vector<8x8xf32> to vector<8x8x1xf32>
    %71 = tpu.reciprocal %70 {approx = true} : vector<8x8x1xf32> -> vector<8x8x1xf32>
    %72 = arith.truncf %68 : vector<8x8x8xf32> to vector<8x8x8xbf16>
    "tpu.trace_start"() <{level = 10 : i32, message = "zqk,zke->zqe"}> : () -> ()
    %cst_20 = arith.constant dense<0.000000e+00> : vector<8x8x8xf32>
    %73 = tpu.matmul %72, %59, %cst_20 {dimension_numbers = #tpu.dot_dimension_numbers<[2], [1], [1], [2], [0, 0, 0, 1, 1, 2], [0], [0]>} : vector<8x8x8xbf16>, vector<8x8x8xbf16>, vector<8x8x8xf32> -> vector<8x8x8xf32>
    "tpu.trace_stop"() : () -> ()
    %74 = vector.broadcast %71 : vector<8x8x1xf32> to vector<8x8x8xf32>
    %75 = arith.mulf %73, %74 : vector<8x8x8xf32>
    %76 = vector.extract_strided_slice %75 {offsets = [0, 0, 0], sizes = [2, 8, 8], strides = [1, 1, 1]} : vector<8x8x8xf32> to vector<2x8x8xf32>
    %77 = vector.extract_strided_slice %75 {offsets = [2, 0, 0], sizes = [2, 8, 8], strides = [1, 1, 1]} : vector<8x8x8xf32> to vector<2x8x8xf32>
    %78 = vector.extract_strided_slice %75 {offsets = [4, 0, 0], sizes = [2, 8, 8], strides = [1, 1, 1]} : vector<8x8x8xf32> to vector<2x8x8xf32>
    %79 = vector.extract_strided_slice %75 {offsets = [6, 0, 0], sizes = [2, 8, 8], strides = [1, 1, 1]} : vector<8x8x8xf32> to vector<2x8x8xf32>
    %80 = tpu.concatenate %76, %77, %78, %79 in 2 : vector<2x8x8xf32>, vector<2x8x8xf32>, vector<2x8x8xf32>, vector<2x8x8xf32> -> vector<2x8x32xf32>
    %81 = vector.shape_cast %80 : vector<2x8x32xf32> to vector<16x32xf32>
    %82 = arith.truncf %81 : vector<16x32xf32> to vector<16x32xbf16>
    %c0_21 = arith.constant 0 : index
    %c0_22 = arith.constant 0 : index
    %c0_23 = arith.constant 0 : index
    %83 = vector.load %arg5[%c0_21, %c0_22, %c0_23] : memref<2x32x32xbf16, #tpu.memory_space<vmem>>, vector<1x32x32xbf16>
    %84 = vector.shape_cast %83 : vector<1x32x32xbf16> to vector<32x32xbf16>
    %cst_24 = arith.constant dense<0.000000e+00> : vector<16x32xf32>
    %85 = tpu.matmul %82, %84, %cst_24 {dimension_numbers = #tpu.dot_dimension_numbers<[1], [0], [0], [1], [0, 0, 1, 1], [], []>} : vector<16x32xbf16>, vector<32x32xbf16>, vector<16x32xf32> -> vector<16x32xf32>
    %86 = arith.addf %5, %85 : vector<16x32xf32>
    %c0_25 = arith.constant 0 : index
    %c0_26 = arith.constant 0 : index
    %c0_27 = arith.constant 0 : index
    %87 = vector.load %arg6[%c0_25, %c0_26, %c0_27] : memref<2x1x32xf32, #tpu.memory_space<vmem>>, vector<1x1x32xf32>
    %88 = vector.shape_cast %87 : vector<1x1x32xf32> to vector<1x32xf32>
    %89 = vector.broadcast %88 : vector<1x32xf32> to vector<16x32xf32>
    %90 = arith.addf %86, %89 : vector<16x32xf32>
    %cst_28 = arith.constant dense<0.000000e+00> : vector<16xf32>
    %91 = vector.multi_reduction <add>, %90, %cst_28 [1] : vector<16x32xf32> to vector<16xf32>
    %92 = vector.shape_cast %91 : vector<16xf32> to vector<16x1xf32>
    %cst_29 = arith.constant 3.200000e+01 : f32
    %93 = vector.broadcast %cst_29 : f32 to vector<16x1xf32>
    %94 = arith.divf %92, %93 : vector<16x1xf32>
    %95 = vector.broadcast %94 : vector<16x1xf32> to vector<16x32xf32>
    %96 = arith.subf %90, %95 : vector<16x32xf32>
    %97 = arith.mulf %96, %96 : vector<16x32xf32>
    %cst_30 = arith.constant dense<0.000000e+00> : vector<16xf32>
    %98 = vector.multi_reduction <add>, %97, %cst_30 [1] : vector<16x32xf32> to vector<16xf32>
    %99 = vector.shape_cast %98 : vector<16xf32> to vector<16x1xf32>
    %cst_31 = arith.constant 3.200000e+01 : f32
    %100 = vector.broadcast %cst_31 : f32 to vector<16x1xf32>
    %101 = arith.divf %99, %100 : vector<16x1xf32>
    %102 = vector.broadcast %94 : vector<16x1xf32> to vector<16x32xf32>
    %103 = arith.subf %90, %102 : vector<16x32xf32>
    %cst_32 = arith.constant 9.99999974E-6 : f32
    %104 = vector.broadcast %cst_32 : f32 to vector<16x1xf32>
    %105 = arith.addf %101, %104 : vector<16x1xf32>
    %106 = math.rsqrt %105 : vector<16x1xf32>
    %107 = vector.broadcast %106 : vector<16x1xf32> to vector<16x32xf32>
    %108 = arith.mulf %103, %107 : vector<16x32xf32>
    %109 = arith.truncf %108 : vector<16x32xf32> to vector<16x32xbf16>
    %c0_33 = arith.constant 0 : index
    %c0_34 = arith.constant 0 : index
    %c0_35 = arith.constant 0 : index
    %110 = vector.load %arg7[%c0_33, %c0_34, %c0_35] : memref<2x32x128xbf16, #tpu.memory_space<vmem>>, vector<1x32x128xbf16>
    %111 = vector.shape_cast %110 : vector<1x32x128xbf16> to vector<32x128xbf16>
    %cst_36 = arith.constant dense<0.000000e+00> : vector<16x128xf32>
    %112 = tpu.matmul %109, %111, %cst_36 {dimension_numbers = #tpu.dot_dimension_numbers<[1], [0], [0], [1], [0, 0, 1, 1], [], []>} : vector<16x32xbf16>, vector<32x128xbf16>, vector<16x128xf32> -> vector<16x128xf32>
    %c0_37 = arith.constant 0 : index
    %c0_38 = arith.constant 0 : index
    %c0_39 = arith.constant 0 : index
    %113 = vector.load %arg8[%c0_37, %c0_38, %c0_39] : memref<2x1x128xf32, #tpu.memory_space<vmem>>, vector<1x1x128xf32>
    %114 = vector.shape_cast %113 : vector<1x1x128xf32> to vector<1x128xf32>
    %115 = vector.broadcast %114 : vector<1x128xf32> to vector<16x128xf32>
    %116 = arith.addf %112, %115 : vector<16x128xf32>
    %cst_40 = arith.constant 1.702000e+00 : f32
    %117 = vector.broadcast %cst_40 : f32 to vector<16x128xf32>
    %118 = arith.mulf %117, %116 : vector<16x128xf32>
    %119 = arith.negf %118 : vector<16x128xf32>
    %120 = math.exp %119 : vector<16x128xf32>
    %cst_41 = arith.constant 1.000000e+00 : f32
    %121 = vector.broadcast %cst_41 : f32 to vector<16x128xf32>
    %122 = arith.addf %121, %120 : vector<16x128xf32>
    %123 = arith.divf %121, %122 : vector<16x128xf32>
    %124 = arith.mulf %116, %123 : vector<16x128xf32>
    %125 = arith.truncf %124 : vector<16x128xf32> to vector<16x128xbf16>
    %c0_42 = arith.constant 0 : index
    %c0_43 = arith.constant 0 : index
    %c0_44 = arith.constant 0 : index
    %126 = vector.load %arg9[%c0_42, %c0_43, %c0_44] : memref<2x128x32xbf16, #tpu.memory_space<vmem>>, vector<1x128x32xbf16>
    %127 = vector.shape_cast %126 : vector<1x128x32xbf16> to vector<128x32xbf16>
    %cst_45 = arith.constant dense<0.000000e+00> : vector<16x32xf32>
    %128 = tpu.matmul %125, %127, %cst_45 {dimension_numbers = #tpu.dot_dimension_numbers<[1], [0], [0], [1], [0, 0, 1, 1], [], []>} : vector<16x128xbf16>, vector<128x32xbf16>, vector<16x32xf32> -> vector<16x32xf32>
    %129 = arith.addf %90, %128 : vector<16x32xf32>
    %c0_46 = arith.constant 0 : index
    %c0_47 = arith.constant 0 : index
    %c0_48 = arith.constant 0 : index
    %130 = vector.load %arg10[%c0_46, %c0_47, %c0_48] : memref<2x1x32xf32, #tpu.memory_space<vmem>>, vector<1x1x32xf32>
    %131 = vector.shape_cast %130 : vector<1x1x32xf32> to vector<1x32xf32>
    %132 = vector.broadcast %131 : vector<1x32xf32> to vector<16x32xf32>
    %133 = arith.addf %129, %132 : vector<16x32xf32>
    %cst_49 = arith.constant dense<0.000000e+00> : vector<16xf32>
    %134 = vector.multi_reduction <add>, %133, %cst_49 [1] : vector<16x32xf32> to vector<16xf32>
    %135 = vector.shape_cast %134 : vector<16xf32> to vector<16x1xf32>
    %cst_50 = arith.constant 3.200000e+01 : f32
    %136 = vector.broadcast %cst_50 : f32 to vector<16x1xf32>
    %137 = arith.divf %135, %136 : vector<16x1xf32>
    %138 = vector.broadcast %137 : vector<16x1xf32> to vector<16x32xf32>
    %139 = arith.subf %133, %138 : vector<16x32xf32>
    %140 = arith.mulf %139, %139 : vector<16x32xf32>
    %cst_51 = arith.constant dense<0.000000e+00> : vector<16xf32>
    %141 = vector.multi_reduction <add>, %140, %cst_51 [1] : vector<16x32xf32> to vector<16xf32>
    %142 = vector.shape_cast %141 : vector<16xf32> to vector<16x1xf32>
    %cst_52 = arith.constant 3.200000e+01 : f32
    %143 = vector.broadcast %cst_52 : f32 to vector<16x1xf32>
    %144 = arith.divf %142, %143 : vector<16x1xf32>
    %145 = vector.broadcast %137 : vector<16x1xf32> to vector<16x32xf32>
    %146 = arith.subf %133, %145 : vector<16x32xf32>
    %cst_53 = arith.constant 9.99999974E-6 : f32
    %147 = vector.broadcast %cst_53 : f32 to vector<16x1xf32>
    %148 = arith.addf %144, %147 : vector<16x1xf32>
    %149 = math.rsqrt %148 : vector<16x1xf32>
    %150 = vector.broadcast %149 : vector<16x1xf32> to vector<16x32xf32>
    %151 = arith.mulf %146, %150 : vector<16x32xf32>
    %152 = arith.truncf %151 : vector<16x32xf32> to vector<16x32xbf16>
    %c1 = arith.constant 1 : index
    %c0_54 = arith.constant 0 : index
    %c0_55 = arith.constant 0 : index
    %153 = vector.load %arg3[%c1, %c0_54, %c0_55] : memref<2x32x96xbf16, #tpu.memory_space<vmem>>, vector<1x32x96xbf16>
    %154 = vector.shape_cast %153 : vector<1x32x96xbf16> to vector<32x96xbf16>
    %cst_56 = arith.constant dense<0.000000e+00> : vector<16x96xf32>
    %155 = tpu.matmul %152, %154, %cst_56 {dimension_numbers = #tpu.dot_dimension_numbers<[1], [0], [0], [1], [0, 0, 1, 1], [], []>} : vector<16x32xbf16>, vector<32x96xbf16>, vector<16x96xf32> -> vector<16x96xf32>
    %c1_57 = arith.constant 1 : index
    %c0_58 = arith.constant 0 : index
    %c0_59 = arith.constant 0 : index
    %156 = vector.load %arg4[%c1_57, %c0_58, %c0_59] : memref<2x1x96xf32, #tpu.memory_space<vmem>>, vector<1x1x96xf32>
    %157 = vector.shape_cast %156 : vector<1x1x96xf32> to vector<1x96xf32>
    %158 = vector.broadcast %157 : vector<1x96xf32> to vector<16x96xf32>
    %159 = arith.addf %155, %158 : vector<16x96xf32>
    %160 = vector.shape_cast %159 : vector<16x96xf32> to vector<2x8x96xf32>
    %161 = vector.extract_strided_slice %160 {offsets = [0, 0, 0], sizes = [2, 8, 32], strides = [1, 1, 1]} : vector<2x8x96xf32> to vector<2x8x32xf32>
    %162 = vector.extract_strided_slice %160 {offsets = [0, 0, 32], sizes = [2, 8, 32], strides = [1, 1, 1]} : vector<2x8x96xf32> to vector<2x8x32xf32>
    %163 = vector.extract_strided_slice %160 {offsets = [0, 0, 64], sizes = [2, 8, 32], strides = [1, 1, 1]} : vector<2x8x96xf32> to vector<2x8x32xf32>
    %164 = vector.extract_strided_slice %161 {offsets = [0, 0, 0], sizes = [2, 8, 8], strides = [1, 1, 1]} : vector<2x8x32xf32> to vector<2x8x8xf32>
    %165 = vector.extract_strided_slice %161 {offsets = [0, 0, 8], sizes = [2, 8, 8], strides = [1, 1, 1]} : vector<2x8x32xf32> to vector<2x8x8xf32>
    %166 = vector.extract_strided_slice %161 {offsets = [0, 0, 16], sizes = [2, 8, 8], strides = [1, 1, 1]} : vector<2x8x32xf32> to vector<2x8x8xf32>
    %167 = vector.extract_strided_slice %161 {offsets = [0, 0, 24], sizes = [2, 8, 8], strides = [1, 1, 1]} : vector<2x8x32xf32> to vector<2x8x8xf32>
    %168 = tpu.concatenate %164, %165, %166, %167 in 0 : vector<2x8x8xf32>, vector<2x8x8xf32>, vector<2x8x8xf32>, vector<2x8x8xf32> -> vector<8x8x8xf32>
    %169 = arith.truncf %168 : vector<8x8x8xf32> to vector<8x8x8xbf16>
    %170 = vector.extract_strided_slice %162 {offsets = [0, 0, 0], sizes = [2, 8, 8], strides = [1, 1, 1]} : vector<2x8x32xf32> to vector<2x8x8xf32>
    %171 = vector.extract_strided_slice %162 {offsets = [0, 0, 8], sizes = [2, 8, 8], strides = [1, 1, 1]} : vector<2x8x32xf32> to vector<2x8x8xf32>
    %172 = vector.extract_strided_slice %162 {offsets = [0, 0, 16], sizes = [2, 8, 8], strides = [1, 1, 1]} : vector<2x8x32xf32> to vector<2x8x8xf32>
    %173 = vector.extract_strided_slice %162 {offsets = [0, 0, 24], sizes = [2, 8, 8], strides = [1, 1, 1]} : vector<2x8x32xf32> to vector<2x8x8xf32>
    %174 = tpu.concatenate %170, %171, %172, %173 in 0 : vector<2x8x8xf32>, vector<2x8x8xf32>, vector<2x8x8xf32>, vector<2x8x8xf32> -> vector<8x8x8xf32>
    %175 = arith.truncf %174 : vector<8x8x8xf32> to vector<8x8x8xbf16>
    %176 = vector.extract_strided_slice %163 {offsets = [0, 0, 0], sizes = [2, 8, 8], strides = [1, 1, 1]} : vector<2x8x32xf32> to vector<2x8x8xf32>
    %177 = vector.extract_strided_slice %163 {offsets = [0, 0, 8], sizes = [2, 8, 8], strides = [1, 1, 1]} : vector<2x8x32xf32> to vector<2x8x8xf32>
    %178 = vector.extract_strided_slice %163 {offsets = [0, 0, 16], sizes = [2, 8, 8], strides = [1, 1, 1]} : vector<2x8x32xf32> to vector<2x8x8xf32>
    %179 = vector.extract_strided_slice %163 {offsets = [0, 0, 24], sizes = [2, 8, 8], strides = [1, 1, 1]} : vector<2x8x32xf32> to vector<2x8x8xf32>
    %180 = tpu.concatenate %176, %177, %178, %179 in 0 : vector<2x8x8xf32>, vector<2x8x8xf32>, vector<2x8x8xf32>, vector<2x8x8xf32> -> vector<8x8x8xf32>
    %181 = arith.truncf %180 : vector<8x8x8xf32> to vector<8x8x8xbf16>
    "tpu.trace_start"() <{level = 10 : i32, message = "zqe,zke->zqk"}> : () -> ()
    %cst_60 = arith.constant dense<0.000000e+00> : vector<8x8x8xf32>
    %182 = tpu.matmul %169, %175, %cst_60 {dimension_numbers = #tpu.dot_dimension_numbers<[2], [2], [1], [1], [0, 0, 0, 1, 1, 1], [0], [0]>} : vector<8x8x8xbf16>, vector<8x8x8xbf16>, vector<8x8x8xf32> -> vector<8x8x8xf32>
    "tpu.trace_stop"() : () -> ()
    %183 = vector.shape_cast %11 : vector<8x8xf32> to vector<1x8x8xf32>
    %184 = vector.broadcast %183 : vector<1x8x8xf32> to vector<8x8x8xf32>
    %185 = arith.addf %182, %184 : vector<8x8x8xf32>
    %cst_61 = arith.constant dense<0xFF800000> : vector<8x8xf32>
    %186 = vector.multi_reduction <maximumf>, %185, %cst_61 [2] : vector<8x8x8xf32> to vector<8x8xf32>
    %187 = vector.shape_cast %186 : vector<8x8xf32> to vector<8x8x1xf32>
    %188 = vector.broadcast %187 : vector<8x8x1xf32> to vector<8x8x8xf32>
    %189 = arith.subf %185, %188 : vector<8x8x8xf32>
    %190 = math.exp %189 : vector<8x8x8xf32>
    %cst_62 = arith.constant dense<0.000000e+00> : vector<8x8xf32>
    %191 = vector.multi_reduction <add>, %190, %cst_62 [2] : vector<8x8x8xf32> to vector<8x8xf32>
    %192 = vector.shape_cast %191 : vector<8x8xf32> to vector<8x8x1xf32>
    %193 = tpu.reciprocal %192 {approx = true} : vector<8x8x1xf32> -> vector<8x8x1xf32>
    %194 = arith.truncf %190 : vector<8x8x8xf32> to vector<8x8x8xbf16>
    "tpu.trace_start"() <{level = 10 : i32, message = "zqk,zke->zqe"}> : () -> ()
    %cst_63 = arith.constant dense<0.000000e+00> : vector<8x8x8xf32>
    %195 = tpu.matmul %194, %181, %cst_63 {dimension_numbers = #tpu.dot_dimension_numbers<[2], [1], [1], [2], [0, 0, 0, 1, 1, 2], [0], [0]>} : vector<8x8x8xbf16>, vector<8x8x8xbf16>, vector<8x8x8xf32> -> vector<8x8x8xf32>
    "tpu.trace_stop"() : () -> ()
    %196 = vector.broadcast %193 : vector<8x8x1xf32> to vector<8x8x8xf32>
    %197 = arith.mulf %195, %196 : vector<8x8x8xf32>
    %198 = vector.extract_strided_slice %197 {offsets = [0, 0, 0], sizes = [2, 8, 8], strides = [1, 1, 1]} : vector<8x8x8xf32> to vector<2x8x8xf32>
    %199 = vector.extract_strided_slice %197 {offsets = [2, 0, 0], sizes = [2, 8, 8], strides = [1, 1, 1]} : vector<8x8x8xf32> to vector<2x8x8xf32>
    %200 = vector.extract_strided_slice %197 {offsets = [4, 0, 0], sizes = [2, 8, 8], strides = [1, 1, 1]} : vector<8x8x8xf32> to vector<2x8x8xf32>
    %201 = vector.extract_strided_slice %197 {offsets = [6, 0, 0], sizes = [2, 8, 8], strides = [1, 1, 1]} : vector<8x8x8xf32> to vector<2x8x8xf32>
    %202 = tpu.concatenate %198, %199, %200, %201 in 2 : vector<2x8x8xf32>, vector<2x8x8xf32>, vector<2x8x8xf32>, vector<2x8x8xf32> -> vector<2x8x32xf32>
    %203 = vector.shape_cast %202 : vector<2x8x32xf32> to vector<16x32xf32>
    %204 = arith.truncf %203 : vector<16x32xf32> to vector<16x32xbf16>
    %c1_64 = arith.constant 1 : index
    %c0_65 = arith.constant 0 : index
    %c0_66 = arith.constant 0 : index
    %205 = vector.load %arg5[%c1_64, %c0_65, %c0_66] : memref<2x32x32xbf16, #tpu.memory_space<vmem>>, vector<1x32x32xbf16>
    %206 = vector.shape_cast %205 : vector<1x32x32xbf16> to vector<32x32xbf16>
    %cst_67 = arith.constant dense<0.000000e+00> : vector<16x32xf32>
    %207 = tpu.matmul %204, %206, %cst_67 {dimension_numbers = #tpu.dot_dimension_numbers<[1], [0], [0], [1], [0, 0, 1, 1], [], []>} : vector<16x32xbf16>, vector<32x32xbf16>, vector<16x32xf32> -> vector<16x32xf32>
    %208 = arith.addf %133, %207 : vector<16x32xf32>
    %c1_68 = arith.constant 1 : index
    %c0_69 = arith.constant 0 : index
    %c0_70 = arith.constant 0 : index
    %209 = vector.load %arg6[%c1_68, %c0_69, %c0_70] : memref<2x1x32xf32, #tpu.memory_space<vmem>>, vector<1x1x32xf32>
    %210 = vector.shape_cast %209 : vector<1x1x32xf32> to vector<1x32xf32>
    %211 = vector.broadcast %210 : vector<1x32xf32> to vector<16x32xf32>
    %212 = arith.addf %208, %211 : vector<16x32xf32>
    %cst_71 = arith.constant dense<0.000000e+00> : vector<16xf32>
    %213 = vector.multi_reduction <add>, %212, %cst_71 [1] : vector<16x32xf32> to vector<16xf32>
    %214 = vector.shape_cast %213 : vector<16xf32> to vector<16x1xf32>
    %cst_72 = arith.constant 3.200000e+01 : f32
    %215 = vector.broadcast %cst_72 : f32 to vector<16x1xf32>
    %216 = arith.divf %214, %215 : vector<16x1xf32>
    %217 = vector.broadcast %216 : vector<16x1xf32> to vector<16x32xf32>
    %218 = arith.subf %212, %217 : vector<16x32xf32>
    %219 = arith.mulf %218, %218 : vector<16x32xf32>
    %cst_73 = arith.constant dense<0.000000e+00> : vector<16xf32>
    %220 = vector.multi_reduction <add>, %219, %cst_73 [1] : vector<16x32xf32> to vector<16xf32>
    %221 = vector.shape_cast %220 : vector<16xf32> to vector<16x1xf32>
    %cst_74 = arith.constant 3.200000e+01 : f32
    %222 = vector.broadcast %cst_74 : f32 to vector<16x1xf32>
    %223 = arith.divf %221, %222 : vector<16x1xf32>
    %224 = vector.broadcast %216 : vector<16x1xf32> to vector<16x32xf32>
    %225 = arith.subf %212, %224 : vector<16x32xf32>
    %cst_75 = arith.constant 9.99999974E-6 : f32
    %226 = vector.broadcast %cst_75 : f32 to vector<16x1xf32>
    %227 = arith.addf %223, %226 : vector<16x1xf32>
    %228 = math.rsqrt %227 : vector<16x1xf32>
    %229 = vector.broadcast %228 : vector<16x1xf32> to vector<16x32xf32>
    %230 = arith.mulf %225, %229 : vector<16x32xf32>
    %231 = arith.truncf %230 : vector<16x32xf32> to vector<16x32xbf16>
    %c1_76 = arith.constant 1 : index
    %c0_77 = arith.constant 0 : index
    %c0_78 = arith.constant 0 : index
    %232 = vector.load %arg7[%c1_76, %c0_77, %c0_78] : memref<2x32x128xbf16, #tpu.memory_space<vmem>>, vector<1x32x128xbf16>
    %233 = vector.shape_cast %232 : vector<1x32x128xbf16> to vector<32x128xbf16>
    %cst_79 = arith.constant dense<0.000000e+00> : vector<16x128xf32>
    %234 = tpu.matmul %231, %233, %cst_79 {dimension_numbers = #tpu.dot_dimension_numbers<[1], [0], [0], [1], [0, 0, 1, 1], [], []>} : vector<16x32xbf16>, vector<32x128xbf16>, vector<16x128xf32> -> vector<16x128xf32>
    %c1_80 = arith.constant 1 : index
    %c0_81 = arith.constant 0 : index
    %c0_82 = arith.constant 0 : index
    %235 = vector.load %arg8[%c1_80, %c0_81, %c0_82] : memref<2x1x128xf32, #tpu.memory_space<vmem>>, vector<1x1x128xf32>
    %236 = vector.shape_cast %235 : vector<1x1x128xf32> to vector<1x128xf32>
    %237 = vector.broadcast %236 : vector<1x128xf32> to vector<16x128xf32>
    %238 = arith.addf %234, %237 : vector<16x128xf32>
    %cst_83 = arith.constant 1.702000e+00 : f32
    %239 = vector.broadcast %cst_83 : f32 to vector<16x128xf32>
    %240 = arith.mulf %239, %238 : vector<16x128xf32>
    %241 = arith.negf %240 : vector<16x128xf32>
    %242 = math.exp %241 : vector<16x128xf32>
    %cst_84 = arith.constant 1.000000e+00 : f32
    %243 = vector.broadcast %cst_84 : f32 to vector<16x128xf32>
    %244 = arith.addf %243, %242 : vector<16x128xf32>
    %245 = arith.divf %243, %244 : vector<16x128xf32>
    %246 = arith.mulf %238, %245 : vector<16x128xf32>
    %247 = arith.truncf %246 : vector<16x128xf32> to vector<16x128xbf16>
    %c1_85 = arith.constant 1 : index
    %c0_86 = arith.constant 0 : index
    %c0_87 = arith.constant 0 : index
    %248 = vector.load %arg9[%c1_85, %c0_86, %c0_87] : memref<2x128x32xbf16, #tpu.memory_space<vmem>>, vector<1x128x32xbf16>
    %249 = vector.shape_cast %248 : vector<1x128x32xbf16> to vector<128x32xbf16>
    %cst_88 = arith.constant dense<0.000000e+00> : vector<16x32xf32>
    %250 = tpu.matmul %247, %249, %cst_88 {dimension_numbers = #tpu.dot_dimension_numbers<[1], [0], [0], [1], [0, 0, 1, 1], [], []>} : vector<16x128xbf16>, vector<128x32xbf16>, vector<16x32xf32> -> vector<16x32xf32>
    %251 = arith.addf %212, %250 : vector<16x32xf32>
    %c1_89 = arith.constant 1 : index
    %c0_90 = arith.constant 0 : index
    %c0_91 = arith.constant 0 : index
    %252 = vector.load %arg10[%c1_89, %c0_90, %c0_91] : memref<2x1x32xf32, #tpu.memory_space<vmem>>, vector<1x1x32xf32>
    %253 = vector.shape_cast %252 : vector<1x1x32xf32> to vector<1x32xf32>
    %254 = vector.broadcast %253 : vector<1x32xf32> to vector<16x32xf32>
    %255 = arith.addf %251, %254 : vector<16x32xf32>
    %256 = vector.shape_cast %255 : vector<16x32xf32> to vector<2x8x32xf32>
    %257 = tpu.iota {dimensions = array<i32: 1>} : vector<2x8x32xi32>
    %c0_92 = arith.constant 0 : index
    %c0_93 = arith.constant 0 : index
    %c0_94 = arith.constant 0 : index
    %258 = vector.load %arg0[%c0_92, %c0_93, %c0_94] : memref<2x1x1xi32, #tpu.memory_space<vmem>>, vector<2x1x1xi32>
    %259 = vector.broadcast %258 : vector<2x1x1xi32> to vector<2x8x32xi32>
    %260 = arith.cmpi eq, %257, %259 : vector<2x8x32xi32>
    %261 = arith.extui %260 : vector<2x8x32xi1> to vector<2x8x32xi32>
    %262 = arith.sitofp %261 : vector<2x8x32xi32> to vector<2x8x32xf32>
    %263 = arith.mulf %262, %256 : vector<2x8x32xf32>
    %cst_95 = arith.constant dense<0.000000e+00> : vector<2x32xf32>
    %264 = vector.multi_reduction <add>, %263, %cst_95 [1] : vector<2x8x32xf32> to vector<2x32xf32>
    %cst_96 = arith.constant dense<0.000000e+00> : vector<2xf32>
    %265 = vector.multi_reduction <add>, %264, %cst_96 [1] : vector<2x32xf32> to vector<2xf32>
    %266 = vector.shape_cast %265 : vector<2xf32> to vector<2x1xf32>
    %cst_97 = arith.constant 3.200000e+01 : f32
    %267 = vector.broadcast %cst_97 : f32 to vector<2x1xf32>
    %268 = arith.divf %266, %267 : vector<2x1xf32>
    %269 = vector.broadcast %268 : vector<2x1xf32> to vector<2x32xf32>
    %270 = arith.subf %264, %269 : vector<2x32xf32>
    %271 = arith.mulf %270, %270 : vector<2x32xf32>
    %cst_98 = arith.constant dense<0.000000e+00> : vector<2xf32>
    %272 = vector.multi_reduction <add>, %271, %cst_98 [1] : vector<2x32xf32> to vector<2xf32>
    %273 = vector.shape_cast %272 : vector<2xf32> to vector<2x1xf32>
    %cst_99 = arith.constant 3.200000e+01 : f32
    %274 = vector.broadcast %cst_99 : f32 to vector<2x1xf32>
    %275 = arith.divf %273, %274 : vector<2x1xf32>
    %276 = vector.broadcast %268 : vector<2x1xf32> to vector<2x32xf32>
    %277 = arith.subf %264, %276 : vector<2x32xf32>
    %cst_100 = arith.constant 9.99999974E-6 : f32
    %278 = vector.broadcast %cst_100 : f32 to vector<2x1xf32>
    %279 = arith.addf %275, %278 : vector<2x1xf32>
    %280 = math.rsqrt %279 : vector<2x1xf32>
    %281 = vector.broadcast %280 : vector<2x1xf32> to vector<2x32xf32>
    %282 = arith.mulf %277, %281 : vector<2x32xf32>
    %283 = arith.truncf %282 : vector<2x32xf32> to vector<2x32xbf16>
    %c0_101 = arith.constant 0 : index
    %c0_102 = arith.constant 0 : index
    %284 = vector.load %arg11[%c0_101, %c0_102] : memref<32x16xbf16, #tpu.memory_space<vmem>>, vector<32x16xbf16>
    %cst_103 = arith.constant dense<0.000000e+00> : vector<2x16xf32>
    %285 = tpu.matmul %283, %284, %cst_103 {dimension_numbers = #tpu.dot_dimension_numbers<[1], [0], [0], [1], [0, 0, 1, 1], [], []>} : vector<2x32xbf16>, vector<32x16xbf16>, vector<2x16xf32> -> vector<2x16xf32>
    %c0_104 = arith.constant 0 : index
    %c0_105 = arith.constant 0 : index
    %286 = vector.load %arg12[%c0_104, %c0_105] : memref<1x16xf32, #tpu.memory_space<vmem>>, vector<1x16xf32>
    %287 = vector.broadcast %286 : vector<1x16xf32> to vector<2x16xf32>
    %288 = arith.addf %285, %287 : vector<2x16xf32>
    %c0_106 = arith.constant 0 : index
    %c0_107 = arith.constant 0 : index
    %289 = vector.load %arg13[%c0_106, %c0_107] : memref<2x16xf32, #tpu.memory_space<vmem>>, vector<2x16xf32>
    tpu.vector_store %arg13[%c0_106, %c0_107], %288 {strides = array<i32>} : memref<2x16xf32, #tpu.memory_space<vmem>>, vector<2x16xf32>,
    return
  }
}

</mosaic_0001>

<bundles_post_ra>
// kernel: text_encoder_forward.1
= control target key start
LH: loop header
LB: loop body
LE: loop exit
PB: predicated region body
PF: predicated region fallthrough
CT: control target
= control target key end

     0   :  { %vm57_vm0 = vcmask 261120   ;;  %s4353_s0 = inlined_call_operand.vmem [shape: s32[2,1,1], index: 0, kind: input, shape index: {}]   ;;  %s4354_s1 = inlined_call_operand.vmem [shape: f32[2,8,32], index: 1, kind: input, shape index: {}]   ;;  %s4355_s2 = inlined_call_operand.vmem [shape: f32[8,32], index: 2, kind: input, shape index: {}]   ;;  %s4356_s3 = inlined_call_operand.vmem [shape: bf16[2,32,96], index: 3, kind: input, shape index: {}]   ;;  %s4357_s4 = inlined_call_operand.vmem [shape: f32[2,1,96], index: 4, kind: input, shape index: {}]   ;;  %s4358_s5 = inlined_call_operand.vmem [shape: bf16[2,32,32], index: 5, kind: input, shape index: {}]   ;;  %s4359_s6 = inlined_call_operand.vmem [shape: f32[2,1,32], index: 6, kind: input, shape index: {}]   ;;  %s4360_s7 = inlined_call_operand.vmem [shape: bf16[2,32,128], index: 7, kind: input, shape index: {}]   ;;  %s4361_s8 = inlined_call_operand.vmem [shape: f32[2,1,128], index: 8, kind: input, shape index: {}]   ;;  %s4362_s9 = inlined_call_operand.vmem [shape: bf16[2,128,32], index: 9, kind: input, shape index: {}]   ;;  %s4363_s10 = inlined_call_operand.vmem [shape: f32[2,1,32], index: 10, kind: input, shape index: {}]   ;;  %s4364_s11 = inlined_call_operand.vmem [shape: bf16[32,16], index: 11, kind: input, shape index: {}]   ;;  %s4365_s12 = inlined_call_operand.vmem [shape: f32[1,16], index: 12, kind: input, shape index: {}]   ;;  %s4366_s13 = inlined_call_operand.hbm [shape: f32[2,16], index: 13, kind: output, shape index: {}]  }
   0x1   :  { %v46_v0 = vld [vmem:[%s4354_s1] sm:$0xff]  ;;  %v47_v2 = vld [vmem:[%s4354_s1 + $0x8] sm:$0xff] }
   0x2   :  { %v48_v1 = vld [vmem:[%s4355_s2] sm:$0xff] }
   0x3   :  { %v3709_v3 = vadd.f32 %v48_v1, %v46_v0  ;;  %v3711_v4 = vadd.f32 %v48_v1, %v47_v2 }
   0x5   :  { %v58_v5 = vsel %vm57_vm0, %v3709_v3, 0.0  ;;  %v61_v6 = vsel %vm57_vm0, %v3711_v4, 0.0 }
   0x6   :  { %59 = vadd.xlane.f32.xlu0 %v58_v5 }
   0xa   :  { %62 = vadd.xlane.f32.xlu0 %v61_v6 }
   0xb   :  { %18 = vsyncpa [#allocation3], 0  ;;  %v3465_v17 = vld [vmem:[%s4356_s3] sm:$0xff]   ;;  %v3617_v18 = vmov 0.0   ;;  %vm3618_vm1 = vmmov 0   ;;  %v3466_v19 = vld [vmem:[%s4356_s3 + $0x8] sm:$0xff]  }
   0xc   :  { %3102 = vmatprep.subr.bf16.mxu1 %v3617_v18  ;;  %3106 = vmatprep.mubr.msk.bf16.mxu1 %vm3618_vm1, %v3617_v18  ;;  %v2881_v31 = vld [vmem:[%s4357_s4] ss:$0 sm:$0xff]  ;;  %s3619_s18 = smov 112   ;;  %s3620_s19 = smov 120   ;;  %vm184_vm2 = vcmask 64512   ;;  %vm667_vm3 = vcmask 1043456  }
   0xd   :  { %3103 = vmatpush3.bf16.msra.mxu1 %v3465_v17  ;;  %3116 = vmatprep.subr.bf16.mxu0 %v3617_v18  ;;  %s3621_s20 = smov 104   ;;  %s3622_s21 = smov 96   ;;  %v3624_v17 = vmov -1e+09   ;;  %vm1081_vm5 = vcmask 130048   ;;  %vm1084_vm6 = vcmask 195584  }
   0xe   :  { %3104 = vmatprep.subr.bf16.mxu1 %v3617_v18  ;;  %3118 = vmatprep.mubr.msk.bf16.mxu0 %vm3618_vm1, %v3617_v18  ;;  %s3623_s22 = smov 64   ;;  %s3625_s23 = smov 8   ;;  %vm2757_vm9 = vcmask 1041409   ;;  %vm2760_vm10 = vcmask 254976   ;;  %vm2865_vm11 = vcmask 123904  }
   0xf   :  { %s3626_s28 = smov 16   ;;  %s3627_s29 = smov 24  }
  0x11   :  { %3105 = vmatpush3.bf16.msra.mxu1 %v3466_v19 }
  0x12   :  { %3110 = vmatprep.subr.bf16.mxu1 %v3617_v18 }
  0x93   :  { %v60_v7 = vpop.xlane.xlu0 %59 }
  0x94   :  { %v65_v8 = vmul.f32 0.03125, %v60_v7 }
  0x96   :  { %v67_v9 = vsub.f32 %v3709_v3, %v65_v8 }
  0x97   :  { %v63_v10 = vpop.xlane.xlu0 %62 }
  0x98   :  { %v66_v11 = vmul.f32 0.03125, %v63_v10  ;;  %v69_v12 = vmul.f32 %v67_v9, %v67_v9 }
  0x9a   :  { %v68_v13 = vsub.f32 %v3711_v4, %v66_v11  ;;  %v71_v14 = vsel %vm57_vm0, %v69_v12, 0.0 }
  0x9b   :  { %72 = vadd.xlane.f32.xlu1 %v71_v14  ;;  %v51_v14 = vlaneseq }
  0x9c   :  { %v70_v15 = vmul.f32 %v68_v13, %v68_v13 }
  0x9e   :  { %v74_v16 = vsel %vm57_vm0, %v70_v15, 0.0  ;;  %v3816_v15 = vshrl.u32 %v51_v14, 7 }
  0x9f   :  { %75 = vadd.xlane.f32.xlu1 %v74_v16  ;;  %v54_v16 = vand.u32 127, %v51_v14 }
  0xa1   :  { %vm55_vm4 = vcmp.le.s32.totalorder %v54_v16, %v3816_v15 }
  0xa2   :  { %v3819_v19 = vsel %vm55_vm4, 0.0, %v3624_v17 }
 0x128   :  { %v73_v20 = vpop.xlane.xlu1 %72 }
 0x129   :  { %v77_v21 = vmul.f32 0.03125, %v73_v20 }
 0x12b   :  { %v79_v22 = vadd.f32 1e-05, %v77_v21 }
 0x12c   :  { %v76_v23 = vpop.xlane.xlu1 %75 }
 0x12d   :  { %v78_v24 = vmul.f32 0.03125, %v76_v23  ;;  %3495 = vrsqrt.f32 %v79_v22 }
 0x12f   :  { %v80_v25 = vadd.f32 1e-05, %v78_v24 }
 0x131   :  { %3497 = vrsqrt.f32 %v80_v25 }
 0x137   :  { %v3496_v26 = vpop.eup %3495 }
 0x138   :  { %v83_v28 = vmul.f32 %v3496_v26, %v67_v9 }
 0x13b   :  { %v3498_v27 = vpop.eup %3497 }
 0x13c   :  { %v84_v29 = vmul.f32 %v3498_v27, %v68_v13 }
 0x13e   :  { %v85_v30 = vpack.c.bf16 %v84_v29, %v83_v28 }
 0x140   :  { %3107 = vmatmul.mubr.msk.bf16.vlgmr.msra.gmra.mrb[0].mxu1 %vm57_vm0, %v85_v30 }
 0x141   :  { %3112 = vmatprep.mubr.msk.bf16.mxu1 %vm3618_vm1, %v3617_v18 }
 0x213   :  { %v146_v32 = vpop.f32.mrb[0].mxu1 }
 0x214   :  { %v3108_v33 = vpop.f32.mrb[1].mxu1  ;;  %v147_v35 = vadd.f32 %v2881_v31, %v146_v32 }
 0x215   :  { %v149_v34 = vpop.f32.mrb[2].mxu1 }
 0x216   :  { %v150_v36 = vadd.f32 %v2881_v31, %v149_v34  ;;  %v3109_v37 = vpop.f32.mrb[3].mxu1  ;;  %v173_v40 = vpack.c.bf16 %v147_v35, %v147_v35 }
 0x218   :  { %v3408_v38 = vpack.i.bf16 %v150_v36, %v147_v35  ;;  %v174_v39 = vpack.c.bf16 %v150_v36, %v150_v36 }
 0x21a   :  { %3409 = vrot.lane.b32.xlu1 %v3408_v38, %s3619_s18  ;;  %3404 = vrot.lane.b32.xlu0 %v3408_v38, %s3620_s19 }
 0x21e   :  { %3414 = vrot.lane.b32.xlu1 %v3408_v38, %s3621_s20  ;;  %232 = vrot.lane.b32.xlu0 %v174_v39, %s3622_s21 }
 0x222   :  { %182 = vrot.lane.b32.xlu1 %v173_v40, %s3622_s21 }
 0x28c   :  { %v3410_v41 = vpop.permute.xlu1 %3409  ;;  %v3405_v42 = vpop.permute.xlu0 %3404 }
 0x28d   :  { %v3407_v43 = vunpack.i.h.bf16 %v3405_v42  ;;  %v3406_v44 = vunpack.i.l.bf16 %v3405_v42  ;;  %v3412_v45 = vunpack.i.h.bf16 %v3410_v41  ;;  %v3411_v46 = vunpack.i.l.bf16 %v3410_v41 }
 0x28f   :  { %v176_v47 = vpack.c.bf16 %v3407_v43, %v3407_v43  ;;  %v175_v48 = vpack.c.bf16 %v3406_v44, %v3406_v44  ;;  %v3749_v52 = vpack.c.bf16 %v3412_v45, %v3412_v45  ;;  %v3751_v53 = vpack.c.bf16 %v3411_v46, %v3411_v46 }
 0x290   :  { %v3415_v49 = vpop.permute.xlu1 %3414  ;;  %v233_v50 = vpop.permute.xlu0 %232 }
 0x291   :  { %281 = vrot.lane.b32.xlu1 %v175_v48, %s3622_s21  ;;  %330 = vrot.lane.b32.xlu0 %v176_v47, %s3622_s21  ;;  %v238_v51 = vsel %vm184_vm2, %v233_v50, 0  ;;  %v3417_v54 = vunpack.i.h.bf16 %v3415_v49  ;;  %v3416_v55 = vunpack.i.l.bf16 %v3415_v49 }
 0x292   :  { %3117 = vmatpush3.bf16.xpose.msra.mxu0 %v238_v51 }
 0x293   :  { %3128 = vmatprep.subr.bf16.mxu0 %v3617_v18  ;;  %v3759_v58 = vpack.c.bf16 %v3417_v54, %v3417_v54  ;;  %v3761_v59 = vpack.c.bf16 %v3416_v55, %v3416_v55 }
 0x294   :  { %v183_v56 = vpop.permute.xlu1 %182 }
 0x295   :  { %v189_v57 = vsel %vm184_vm2, %v183_v56, 0  ;;  %379 = vrot.lane.b32.xlu1 %v3751_v53, %s3622_s21  ;;  %428 = vrot.lane.b32.xlu0 %v3749_v52, %s3622_s21 }
 0x296   :  { %3111 = vmatpush3.bf16.xpose.msra.mxu1 %v189_v57 }
 0x297   :  { %3122 = vmatprep.subr.bf16.mxu1 %v3617_v18 }
 0x299   :  { %477 = vrot.lane.b32.xlu1 %v3761_v59, %s3622_s21  ;;  %526 = vrot.lane.b32.xlu0 %v3759_v58, %s3622_s21 }
 0x29a   :  { %3119 = vmatmul.mubr.msk.bf16.vlgmr.msra.gmra.mrb[0].mxu0 %vm184_vm2, %v174_v39 }
 0x29b   :  { %3130 = vmatprep.mubr.msk.bf16.mxu0 %vm3618_vm1, %v3617_v18 }
 0x29d   :  { %3113 = vmatmul.mubr.msk.bf16.vlgmr.msra.gmra.mrb[4].mxu1 %vm184_vm2, %v173_v40  ;;  %662 = vrot.lane.b32.xlu1 %v173_v40, %s3623_s22 }
 0x29e   :  { %711 = vrot.lane.b32.xlu0 %v174_v39, %s3623_s22  ;;  %3124 = vmatprep.mubr.msk.bf16.mxu1 %vm3618_vm1, %v3617_v18 }
 0x2a1   :  { %759 = vrot.lane.b32.xlu1 %v175_v48, %s3623_s22 }
 0x2a5   :  { %807 = vrot.lane.b32.xlu1 %v176_v47, %s3623_s22 }
 0x303   :  { %v282_v60 = vpop.permute.xlu1 %281  ;;  %v331_v61 = vpop.permute.xlu0 %330 }
 0x304   :  { %v287_v62 = vsel %vm184_vm2, %v282_v60, 0  ;;  %v336_v63 = vsel %vm184_vm2, %v331_v61, 0 }
 0x305   :  { %3123 = vmatpush3.bf16.xpose.msra.mxu1 %v287_v62  ;;  %3129 = vmatpush3.bf16.xpose.msra.mxu0 %v336_v63 }
 0x306   :  { %3134 = vmatprep.subr.bf16.mxu1 %v3617_v18  ;;  %3140 = vmatprep.subr.bf16.mxu0 %v3617_v18 }
 0x307   :  { %v380_v0 = vpop.permute.xlu1 %379  ;;  %v429_v1 = vpop.permute.xlu0 %428 }
 0x308   :  { %v385_v2 = vsel %vm184_vm2, %v380_v0, 0  ;;  %v434_v5 = vsel %vm184_vm2, %v429_v1, 0 }
 0x30b   :  { %v478_v6 = vpop.permute.xlu1 %477  ;;  %v527_v7 = vpop.permute.xlu0 %526 }
 0x30c   :  { %3125 = vmatmul.mubr.msk.bf16.vlgmr.msra.gmra.mrb[8].mxu1 %vm184_vm2, %v175_v48  ;;  %3131 = vmatmul.mubr.msk.bf16.vlgmr.msra.gmra.mrb[4].mxu0 %vm184_vm2, %v176_v47  ;;  %v483_v8 = vsel %vm184_vm2, %v478_v6, 0  ;;  %v532_v9 = vsel %vm184_vm2, %v527_v7, 0 }
 0x30d   :  { %3135 = vmatpush3.bf16.xpose.msra.mxu1 %v385_v2  ;;  %3141 = vmatpush3.bf16.xpose.msra.mxu0 %v434_v5 }
 0x30e   :  { %3136 = vmatprep.mubr.msk.bf16.mxu1 %vm3618_vm1, %v3617_v18  ;;  %3142 = vmatprep.mubr.msk.bf16.mxu0 %vm3618_vm1, %v3617_v18 }
 0x30f   :  { %3146 = vmatprep.subr.bf16.mxu1 %v3617_v18  ;;  %3152 = vmatprep.subr.bf16.mxu0 %v3617_v18  ;;  %v663_v10 = vpop.permute.xlu1 %662 }
 0x310   :  { %v712_v11 = vpop.permute.xlu0 %711  ;;  %v669_v12 = vsel %vm667_vm3, %v663_v10, 0 }
 0x311   :  { %v717_v13 = vsel %vm667_vm3, %v712_v11, 0 }
 0x313   :  { %v760_v5 = vpop.permute.xlu1 %759 }
 0x314   :  { %3137 = vmatmul.mubr.msk.bf16.vlgmr.msra.gmra.mrb[12].mxu1 %vm184_vm2, %v3751_v53  ;;  %3143 = vmatmul.mubr.msk.bf16.vlgmr.msra.gmra.mrb[8].mxu0 %vm184_vm2, %v3749_v52 }
 0x315   :  { %3147 = vmatpush3.bf16.xpose.msra.mxu1 %v483_v8  ;;  %3153 = vmatpush3.bf16.xpose.msra.mxu0 %v532_v9 }
 0x316   :  { %3148 = vmatprep.mubr.msk.bf16.mxu1 %vm3618_vm1, %v3617_v18  ;;  %3154 = vmatprep.mubr.msk.bf16.mxu0 %vm3618_vm1, %v3617_v18 }
 0x317   :  { %3158 = vmatprep.subr.bf16.mxu1 %v3617_v18  ;;  %3164 = vmatprep.subr.bf16.mxu0 %v3617_v18  ;;  %v808_v6 = vpop.permute.xlu1 %807 }
 0x31c   :  { %3149 = vmatmul.mubr.msk.bf16.vlgmr.msra.gmra.mrb[16].mxu1 %vm184_vm2, %v3761_v59  ;;  %3155 = vmatmul.mubr.msk.bf16.vlgmr.msra.gmra.mrb[12].mxu0 %vm184_vm2, %v3759_v58 }
 0x31d   :  { %3159 = vmatpush3.bf16.msra.mxu1 %v669_v12  ;;  %3165 = vmatpush3.bf16.msra.mxu0 %v717_v13 }
 0x31e   :  { %3166 = vmatprep.mubr.msk.bf16.mxu0 %vm3618_vm1, %v3617_v18  ;;  %3176 = vmatprep.subr.bf16.mxu0 %v3617_v18 }
 0x31f   :  { %3160 = vmatprep.mubr.msk.bf16.mxu1 %vm3618_vm1, %v3617_v18  ;;  %3170 = vmatprep.subr.bf16.mxu1 %v3617_v18 }
 0x36d   :  { %v274_v20 = vpop.f32.mrb[0].mxu0 }
 0x36e   :  { %v275_v21 = vadd.f32 %v274_v20, %v3819_v19  ;;  %v3120_v22 = vpop.f32.mrb[1].mxu0 }
 0x36f   :  { %v277_v23 = vpop.f32.mrb[2].mxu0 }
 0x370   :  { %v3121_v24 = vpop.f32.mrb[3].mxu0  ;;  %v577_v25 = vsel %vm184_vm2, %v275_v21, -inf  ;;  %v225_v26 = vpop.f32.mrb[4].mxu1 }
 0x371   :  { %578 = vmax.xlane.f32.xlu0 %v577_v25  ;;  %v226_v27 = vadd.f32 %v225_v26, %v3819_v19  ;;  %v3114_v28 = vpop.f32.mrb[5].mxu1 }
 0x372   :  { %v228_v29 = vpop.f32.mrb[6].mxu1 }
 0x373   :  { %v3115_v30 = vpop.f32.mrb[7].mxu1  ;;  %v574_v31 = vsel %vm184_vm2, %v226_v27, -inf }
 0x374   :  { %575 = vmax.xlane.f32.xlu1 %v574_v31 }
 0x385   :  { %855 = vrot.lane.b32.xlu1 %v3751_v53, %s3623_s22 }
 0x3df   :  { %v323_v32 = vpop.f32.mrb[8].mxu1  ;;  %v372_v33 = vpop.f32.mrb[4].mxu0 }
 0x3e0   :  { %v3828_v34 = vadd.f32 %v323_v32, %v3819_v19  ;;  %v3126_v35 = vpop.f32.mrb[9].mxu1  ;;  %v3132_v36 = vpop.f32.mrb[5].mxu0  ;;  %v3831_v39 = vadd.f32 %v372_v33, %v3819_v19 }
 0x3e1   :  { %v326_v37 = vpop.f32.mrb[10].mxu1  ;;  %v375_v38 = vpop.f32.mrb[6].mxu0 }
 0x3e2   :  { %v3127_v40 = vpop.f32.mrb[11].mxu1  ;;  %v3133_v41 = vpop.f32.mrb[7].mxu0  ;;  %v580_v42 = vsel %vm184_vm2, %v3828_v34, -inf  ;;  %v583_v43 = vsel %vm184_vm2, %v3831_v39, -inf }
 0x3e3   :  { %581 = vmax.xlane.f32.xlu0 %v580_v42 }
 0x3e7   :  { %v470_v44 = vpop.f32.mrb[8].mxu0  ;;  %584 = vmax.xlane.f32.xlu0 %v583_v43  ;;  %v421_v45 = vpop.f32.mrb[12].mxu1 }
 0x3e8   :  { %v3838_v46 = vadd.f32 %v421_v45, %v3819_v19  ;;  %v3138_v47 = vpop.f32.mrb[13].mxu1  ;;  %v3144_v48 = vpop.f32.mrb[9].mxu0  ;;  %v3870_v20 = vadd.f32 %v470_v44, %v3819_v19 }
 0x3e9   :  { %v424_v49 = vpop.f32.mrb[14].mxu1  ;;  %v473_v50 = vpop.f32.mrb[10].mxu0 }
 0x3ea   :  { %v3139_v51 = vpop.f32.mrb[15].mxu1  ;;  %v3145_v53 = vpop.f32.mrb[11].mxu0  ;;  %v586_v54 = vsel %vm184_vm2, %v3838_v46, -inf  ;;  %v589_v22 = vsel %vm184_vm2, %v3870_v20, -inf }
 0x3eb   :  { %587 = vmax.xlane.f32.xlu1 %v586_v54 }
 0x3ef   :  { %v519_v55 = vpop.f32.mrb[16].mxu1  ;;  %v568_v56 = vpop.f32.mrb[12].mxu0 }
 0x3f0   :  { %v3843_v57 = vadd.f32 %v519_v55, %v3819_v19  ;;  %v3150_v60 = vpop.f32.mrb[17].mxu1  ;;  %v3156_v61 = vpop.f32.mrb[13].mxu0 }
 0x3f1   :  { %v522_v62 = vpop.f32.mrb[18].mxu1  ;;  %v571_v63 = vpop.f32.mrb[14].mxu0 }
 0x3f2   :  { %v3151_v0 = vpop.f32.mrb[19].mxu1  ;;  %v3157_v1 = vpop.f32.mrb[15].mxu0  ;;  %v592_v2 = vsel %vm184_vm2, %v3843_v57, -inf }
 0x3f3   :  { %593 = vmax.xlane.f32.xlu1 %v592_v2 }
 0x3fd   :  { %903 = vrot.lane.b32.xlu0 %v3749_v52, %s3623_s22  ;;  %v813_v52 = vsel %vm667_vm3, %v808_v6, 0 }
 0x3fe   :  { %v579_v7 = vpop.xlane.xlu0 %578 }
 0x3ff   :  { %v599_v8 = vsub.f32 %v275_v21, %v579_v7  ;;  %v3873_v21 = vadd.f32 %v568_v56, %v3819_v19 }
 0x401   :  { %v608_v9 = vmul.f32 1.442695, %v599_v8  ;;  %v576_v10 = vpop.xlane.xlu1 %575  ;;  %v595_v23 = vsel %vm184_vm2, %v3873_v21, -inf }
 0x402   :  { %v598_v11 = vsub.f32 %v226_v27, %v576_v10 }
 0x403   :  { %3499 = vpow2.f32 %v608_v9 }
 0x404   :  { %v606_v12 = vmul.f32 1.442695, %v598_v11  ;;  %951 = vrot.lane.b32.xlu1 %v3761_v59, %s3623_s22  ;;  %v765_v59 = vsel %vm667_vm3, %v760_v5, 0 }
 0x405   :  { %v856_v27 = vpop.permute.xlu1 %855 }
 0x406   :  { %3501 = vpow2.f32 %v606_v12  ;;  %v861_v38 = vsel %vm667_vm3, %v856_v27, 0 }
 0x40d   :  { %v3851_v13 = vpop.eup %3499 }
 0x40e   :  { %v655_v14 = vpack.c.bf16 %v3851_v13, %v3851_v13  ;;  %v625_v8 = vsel %vm184_vm2, %v3851_v13, 0.0 }
 0x410   :  { %v3855_v16 = vpop.eup %3501  ;;  %3167 = vmatmul.mubr.msk.bf16.vlgmr.msra.gmra.mrb[16].mxu0 %vm184_vm2, %v655_v14 }
 0x411   :  { %3177 = vmatpush3.bf16.msra.mxu0 %v813_v52  ;;  %v654_v17 = vpack.c.bf16 %v3855_v16, %v3855_v16  ;;  %3178 = vmatprep.mubr.msk.bf16.mxu0 %vm3618_vm1, %v3617_v18  ;;  %v622_v54 = vsel %vm184_vm2, %v3855_v16, 0.0 }
 0x412   :  { %3188 = vmatprep.subr.bf16.mxu0 %v3617_v18 }
 0x413   :  { %3161 = vmatmul.mubr.msk.bf16.vlgmr.msra.gmra.mrb[20].mxu1 %vm184_vm2, %v654_v17 }
 0x414   :  { %3171 = vmatpush3.bf16.msra.mxu1 %v765_v59  ;;  %3172 = vmatprep.mubr.msk.bf16.mxu1 %vm3618_vm1, %v3617_v18 }
 0x415   :  { %3182 = vmatprep.subr.bf16.mxu1 %v3617_v18 }
 0x41c   :  { %590 = vmax.xlane.f32.xlu0 %v589_v22 }
 0x420   :  { %596 = vmax.xlane.f32.xlu0 %v595_v23 }
 0x436   :  { %999 = vrot.lane.b32.xlu0 %v3759_v58, %s3623_s22 }
 0x470   :  { %v582_v24 = vpop.xlane.xlu0 %581 }
 0x471   :  { %v600_v25 = vsub.f32 %v3828_v34, %v582_v24 }
 0x473   :  { %v610_v26 = vmul.f32 1.442695, %v600_v25 }
 0x474   :  { %v585_v28 = vpop.xlane.xlu0 %584 }
 0x475   :  { %3503 = vpow2.f32 %v610_v26  ;;  %v601_v29 = vsub.f32 %v3831_v39, %v585_v28 }
 0x477   :  { %v612_v30 = vmul.f32 1.442695, %v601_v29 }
 0x478   :  { %v588_v31 = vpop.xlane.xlu1 %587  ;;  %v904_v40 = vpop.permute.xlu0 %903 }
 0x479   :  { %3505 = vpow2.f32 %v612_v30  ;;  %v602_v32 = vsub.f32 %v3838_v46, %v588_v31  ;;  %v909_v44 = vsel %vm667_vm3, %v904_v40, 0 }
 0x47b   :  { %v614_v33 = vmul.f32 1.442695, %v602_v32 }
 0x47d   :  { %3507 = vpow2.f32 %v614_v33 }
 0x47f   :  { %v3504_v35 = vpop.eup %3503 }
 0x480   :  { %v594_v36 = vpop.xlane.xlu1 %593  ;;  %v628_v58 = vsel %vm184_vm2, %v3504_v35, 0.0  ;;  %v656_v37 = vpack.c.bf16 %v3504_v35, %v3504_v35 }
 0x481   :  { %v604_v34 = vsub.f32 %v3843_v57, %v594_v36  ;;  %629 = vadd.xlane.f32.xlu1 %v628_v58 }
 0x482   :  { %3173 = vmatmul.mubr.msk.bf16.vlgmr.msra.gmra.mrb[24].mxu1 %vm184_vm2, %v656_v37 }
 0x483   :  { %v3506_v39 = vpop.eup %3505  ;;  %v618_v41 = vmul.f32 1.442695, %v604_v34  ;;  %3183 = vmatpush3.bf16.msra.mxu1 %v861_v38  ;;  %3184 = vmatprep.mubr.msk.bf16.mxu1 %vm3618_vm1, %v3617_v18 }
 0x484   :  { %v631_v42 = vsel %vm184_vm2, %v3506_v39, 0.0  ;;  %v657_v43 = vpack.c.bf16 %v3506_v39, %v3506_v39  ;;  %3194 = vmatprep.subr.bf16.mxu1 %v3617_v18  ;;  %v952_v46 = vpop.permute.xlu1 %951 }
 0x485   :  { %3509 = vpow2.f32 %v618_v41  ;;  %632 = vadd.xlane.f32.xlu0 %v631_v42  ;;  %v957_v49 = vsel %vm667_vm3, %v952_v46, 0 }
 0x486   :  { %3179 = vmatmul.mubr.msk.bf16.vlgmr.msra.gmra.mrb[20].mxu0 %vm184_vm2, %v657_v43 }
 0x487   :  { %v3508_v45 = vpop.eup %3507  ;;  %3189 = vmatpush3.bf16.msra.mxu0 %v909_v44  ;;  %3190 = vmatprep.mubr.msk.bf16.mxu0 %vm3618_vm1, %v3617_v18  ;;  %v3467_v44 = vld [vmem:[%s4358_s5] sm:$0xff]  }
 0x488   :  { %v634_v47 = vsel %vm184_vm2, %v3508_v45, 0.0  ;;  %v658_v48 = vpack.c.bf16 %v3508_v45, %v3508_v45  ;;  %3200 = vmatprep.subr.bf16.mxu0 %v3617_v18 }
 0x489   :  { %635 = vadd.xlane.f32.xlu0 %v634_v47 }
 0x48a   :  { %3185 = vmatmul.mubr.msk.bf16.vlgmr.msra.gmra.mrb[28].mxu1 %vm184_vm2, %v658_v48 }
 0x48b   :  { %3195 = vmatpush3.bf16.msra.mxu1 %v957_v49  ;;  %3196 = vmatprep.mubr.msk.bf16.mxu1 %vm3618_vm1, %v3617_v18 }
 0x48c   :  { %3206 = vmatprep.subr.bf16.mxu1 %v3617_v18 }
 0x48f   :  { %v3510_v50 = vpop.eup %3509 }
 0x490   :  { %v640_v51 = vsel %vm184_vm2, %v3510_v50, 0.0  ;;  %v660_v53 = vpack.c.bf16 %v3510_v50, %v3510_v50 }
 0x491   :  { %641 = vadd.xlane.f32.xlu1 %v640_v51 }
 0x492   :  { %3197 = vmatmul.mubr.msk.bf16.vlgmr.msra.gmra.mrb[32].mxu1 %vm184_vm2, %v660_v53 }
 0x493   :  { %3210 = vmatprep.mubr.msk.bf16.mxu1 %vm3618_vm1, %v3617_v18  ;;  %3207 = vmatpush3.bf16.msra.mxu1 %v3467_v44 }
 0x494   :  { %3208 = vmatprep.subr.bf16.mxu1 %v3617_v18 }
 0x495   :  { %623 = vadd.xlane.f32.xlu1 %v622_v54  ;;  %v3468_v54 = vld [vmem:[%s4358_s5 + $0x8] sm:$0xff]  }
 0x497   :  { %3209 = vmatpush3.bf16.msra.mxu1 %v3468_v54 }
 0x498   :  { %3222 = vmatprep.subr.bf16.mxu1 %v3617_v18 }
 0x4a9   :  { %v591_v55 = vpop.xlane.xlu0 %590 }
 0x4aa   :  { %v603_v56 = vsub.f32 %v3870_v20, %v591_v55 }
 0x4ac   :  { %v616_v57 = vmul.f32 1.442695, %v603_v56 }
 0x4ad   :  { %v597_v60 = vpop.xlane.xlu0 %596 }
 0x4ae   :  { %3511 = vpow2.f32 %v616_v57  ;;  %v605_v61 = vsub.f32 %v3873_v21, %v597_v60 }
 0x4b0   :  { %v620_v62 = vmul.f32 1.442695, %v605_v61 }
 0x4b1   :  { %v1000_v0 = vpop.permute.xlu0 %999 }
 0x4b2   :  { %3513 = vpow2.f32 %v620_v62  ;;  %v1005_v5 = vsel %vm667_vm3, %v1000_v0, 0 }
 0x4b8   :  { %v3512_v63 = vpop.eup %3511 }
 0x4b9   :  { %v637_v1 = vsel %vm184_vm2, %v3512_v63, 0.0  ;;  %v659_v2 = vpack.c.bf16 %v3512_v63, %v3512_v63 }
 0x4ba   :  { %638 = vadd.xlane.f32.xlu0 %v637_v1 }
 0x4bb   :  { %3191 = vmatmul.mubr.msk.bf16.vlgmr.msra.gmra.mrb[24].mxu0 %vm184_vm2, %v659_v2 }
 0x4bc   :  { %v3514_v6 = vpop.eup %3513  ;;  %3201 = vmatpush3.bf16.msra.mxu0 %v1005_v5  ;;  %3202 = vmatprep.mubr.msk.bf16.mxu0 %vm3618_vm1, %v3617_v18 }
 0x4bd   :  { %v643_v7 = vsel %vm184_vm2, %v3514_v6, 0.0  ;;  %3214 = vmatprep.subr.bf16.mxu0 %v3617_v18  ;;  %v661_v9 = vpack.c.bf16 %v3514_v6, %v3514_v6 }
 0x4be   :  { %644 = vadd.xlane.f32.xlu0 %v643_v7 }
 0x4c2   :  { %626 = vadd.xlane.f32.xlu0 %v625_v8 }
 0x4c3   :  { %3203 = vmatmul.mubr.msk.bf16.vlgmr.msra.gmra.mrb[28].mxu0 %vm184_vm2, %v661_v9 }
 0x4c4   :  { %3218 = vmatprep.mubr.msk.bf16.mxu0 %vm3618_vm1, %v3617_v18 }
 0x4e3   :  { %v3923_v10 = vpop.f32.mrb[16].mxu0 }
 0x4e4   :  { %v3168_v11 = vpop.f32.mrb[17].mxu0 }
 0x4e5   :  { %v756_v12 = vpop.f32.mrb[18].mxu0 }
 0x4e6   :  { %v3169_v14 = vpop.f32.mrb[19].mxu0  ;;  %v3925_v16 = vpop.f32.mrb[20].mxu1 }
 0x4e7   :  { %v3162_v52 = vpop.f32.mrb[21].mxu1 }
 0x4e8   :  { %v708_v17 = vpop.f32.mrb[22].mxu1 }
 0x4e9   :  { %v3163_v59 = vpop.f32.mrb[23].mxu1 }
 0x50e   :  { %v630_v20 = vpop.xlane.xlu1 %629 }
 0x50f   :  { %3515 = vrcp.f32 %v630_v20 }
 0x512   :  { %v633_v21 = vpop.xlane.xlu0 %632 }
 0x513   :  { %3517 = vrcp.f32 %v633_v21 }
 0x516   :  { %v636_v41 = vpop.xlane.xlu0 %635 }
 0x517   :  { %3519 = vrcp.f32 %v636_v41 }
 0x519   :  { %v3516_v24 = vpop.eup %3515 }
 0x51d   :  { %v3518_v26 = vpop.eup %3517 }
 0x51e   :  { %v642_v43 = vpop.xlane.xlu1 %641 }
 0x521   :  { %v3520_v46 = vpop.eup %3519 }
 0x522   :  { %v624_v6 = vpop.xlane.xlu1 %623 }
 0x547   :  { %v639_v42 = vpop.xlane.xlu0 %638 }
 0x548   :  { %3521 = vrcp.f32 %v639_v42 }
 0x549   :  { %3523 = vrcp.f32 %v642_v43 }
 0x54b   :  { %v645_v45 = vpop.xlane.xlu0 %644 }
 0x54c   :  { %3525 = vrcp.f32 %v645_v45 }
 0x54d   :  { %3527 = vrcp.f32 %v624_v6  ;;  %v3476_v6 = vld [vmem:[%s4362_s9 + $0x28] sm:$0xff]  }
 0x54f   :  { %v627_v7 = vpop.xlane.xlu0 %626 }
 0x550   :  { %3529 = vrcp.f32 %v627_v7  ;;  %v3477_v7 = vld [vmem:[%s4362_s9 + $0x30] sm:$0xff]  }
 0x552   :  { %v3522_v47 = vpop.eup %3521 }
 0x553   :  { %v3524_v57 = vpop.eup %3523 }
 0x555   :  { %v801_v13 = vpop.f32.mrb[24].mxu1 }
 0x556   :  { %v3174_v22 = vpop.f32.mrb[25].mxu1  ;;  %v1049_v28 = vmul.f32 %v3516_v24, %v801_v13  ;;  %v3526_v60 = vpop.eup %3525 }
 0x557   :  { %v804_v23 = vpop.f32.mrb[26].mxu1  ;;  %v3528_v9 = vpop.eup %3527 }
 0x558   :  { %v3175_v25 = vpop.f32.mrb[27].mxu1  ;;  %v1047_v20 = vmul.f32 %v3528_v9, %v3925_v16  ;;  %v2905_v9 = vld [vmem:[%s4361_s8] ss:$0 sm:$0xff] }
 0x559   :  { %v849_v27 = vpop.f32.mrb[20].mxu0 }
 0x55a   :  { %v1050_v29 = vmul.f32 %v3518_v26, %v849_v27  ;;  %v3180_v30 = vpop.f32.mrb[21].mxu0  ;;  %v3530_v12 = vpop.eup %3529 }
 0x55b   :  { %v852_v31 = vpop.f32.mrb[22].mxu0  ;;  %v1048_v21 = vmul.f32 %v3530_v12, %v3923_v10  ;;  %v2904_v30 = vld [vmem:[%s4359_s6] ss:$0 sm:$0xff] }
 0x55c   :  { %v3418_v32 = vpack.i.bf16 %v1050_v29, %v1049_v28  ;;  %v3181_v33 = vpop.f32.mrb[23].mxu0 }
 0x55d   :  { %v897_v35 = vpop.f32.mrb[28].mxu1 }
 0x55e   :  { %3419 = vrot.lane.b32.xlu1 %v3418_v32, %s3625_s23  ;;  %v3186_v36 = vpop.f32.mrb[29].mxu1  ;;  %v1051_v49 = vmul.f32 %v3520_v46, %v897_v35 }
 0x55f   :  { %v900_v58 = vpop.f32.mrb[30].mxu1 }
 0x560   :  { %v3187_v37 = vpop.f32.mrb[31].mxu1 }
 0x565   :  { %v993_v34 = vpop.f32.mrb[32].mxu1 }
 0x566   :  { %v3198_v38 = vpop.f32.mrb[33].mxu1  ;;  %v1053_v62 = vmul.f32 %v3524_v57, %v993_v34 }
 0x567   :  { %v996_v39 = vpop.f32.mrb[34].mxu1 }
 0x568   :  { %v3199_v40 = vpop.f32.mrb[35].mxu1 }
 0x58e   :  { %v945_v48 = vpop.f32.mrb[24].mxu0 }
 0x58f   :  { %v1052_v50 = vmul.f32 %v3522_v47, %v945_v48  ;;  %v3192_v51 = vpop.f32.mrb[25].mxu0  ;;  %v3469_v47 = vld [vmem:[%s4360_s7] sm:$0xff]   ;;  %v3470_v48 = vld [vmem:[%s4360_s7 + $0x8] sm:$0xff]  }
 0x590   :  { %v948_v53 = vpop.f32.mrb[26].mxu0  ;;  %3215 = vmatpush3.bf16.msra.mxu0 %v3469_v47 }
 0x591   :  { %v3423_v55 = vpack.i.bf16 %v1052_v50, %v1051_v49  ;;  %v3193_v56 = vpop.f32.mrb[27].mxu0  ;;  %3216 = vmatprep.subr.bf16.mxu0 %v3617_v18 }
 0x593   :  { %3424 = vrot.lane.b32.xlu0 %v3423_v55, %s3626_s28 }
 0x594   :  { %3217 = vmatpush3.bf16.msra.mxu0 %v3470_v48  ;;  %v3479_v48 = vld [vmem:[%s4356_s3 + $0x10] sm:$0xff]  }
 0x595   :  { %3242 = vmatprep.subr.bf16.mxu0 %v3617_v18 }
 0x596   :  { %v1041_v61 = vpop.f32.mrb[28].mxu0 }
 0x597   :  { %v1054_v63 = vmul.f32 %v3526_v60, %v1041_v61  ;;  %v3204_v0 = vpop.f32.mrb[29].mxu0 }
 0x598   :  { %v1044_v1 = vpop.f32.mrb[30].mxu0  ;;  %v3472_v0 = vld [vmem:[%s4362_s9 + $0x8] sm:$0xff]  }
 0x599   :  { %v3428_v2 = vpack.i.bf16 %v1054_v63, %v1053_v62  ;;  %v3205_v5 = vpop.f32.mrb[31].mxu0  ;;  %v3471_v63 = vld [vmem:[%s4362_s9] sm:$0xff]   ;;  %v3473_v1 = vld [vmem:[%s4362_s9 + $0x10] sm:$0xff]  }
 0x59a   :  { %v3475_v5 = vld [vmem:[%s4362_s9 + $0x20] sm:$0xff]  }
 0x59b   :  { %3429 = vrot.lane.b32.xlu1 %v3428_v2, %s3627_s29  ;;  %v3474_v2 = vld [vmem:[%s4362_s9 + $0x18] sm:$0xff]  }
 0x5d0   :  { %v3420_v8 = vpop.permute.xlu1 %3419 }
 0x5d1   :  { %v3422_v14 = vunpack.i.h.bf16 %v3420_v8  ;;  %v3421_v52 = vunpack.i.l.bf16 %v3420_v8  ;;  %v3478_v8 = vld [vmem:[%s4362_s9 + $0x38] sm:$0xff]  }
 0x5d3   :  { %v1080_v22 = vsel %vm184_vm2, %v1048_v21, %v3422_v14  ;;  %v1079_v23 = vsel %vm184_vm2, %v1047_v20, %v3421_v52 }
 0x605   :  { %v3425_v11 = vpop.permute.xlu0 %3424 }
 0x606   :  { %v3427_v17 = vunpack.i.h.bf16 %v3425_v11  ;;  %v3426_v59 = vunpack.i.l.bf16 %v3425_v11 }
 0x608   :  { %v1083_v26 = vsel %vm1081_vm5, %v1080_v22, %v3427_v17  ;;  %v1082_v27 = vsel %vm1081_vm5, %v1079_v23, %v3426_v59 }
 0x60d   :  { %v3430_v13 = vpop.permute.xlu1 %3429 }
 0x60e   :  { %v3432_v24 = vunpack.i.h.bf16 %v3430_v13  ;;  %v3431_v25 = vunpack.i.l.bf16 %v3430_v13 }
 0x610   :  { %v1086_v28 = vsel %vm1084_vm6, %v1083_v26, %v3432_v24  ;;  %v1085_v29 = vsel %vm1084_vm6, %v1082_v27, %v3431_v25 }
 0x611   :  { %v1087_v16 = vpack.c.bf16 %v1086_v28, %v1085_v29 }
 0x613   :  { %3211 = vmatmul.mubr.msk.bf16.vlgmr.msra.gmra.mrb[36].mxu1 %vm57_vm0, %v1087_v16 }
 0x614   :  { %3238 = vmatprep.mubr.msk.bf16.mxu1 %vm3618_vm1, %v3617_v18  ;;  %3223 = vmatpush3.bf16.msra.mxu1 %v3471_v63 }
 0x615   :  { %3224 = vmatprep.subr.bf16.mxu1 %v3617_v18 }
 0x618   :  { %3225 = vmatpush3.bf16.msra.mxu1 %v3472_v0  ;;  %v2925_v0 = vld [vmem:[%s4357_s4 + $0x1] ss:$0 sm:$0xff] }
 0x619   :  { %3226 = vmatprep.subr.bf16.mxu1 %v3617_v18 }
 0x61c   :  { %3227 = vmatpush3.bf16.msra.mxu1 %v3473_v1 }
 0x61d   :  { %3228 = vmatprep.subr.bf16.mxu1 %v3617_v18 }
 0x620   :  { %3229 = vmatpush3.bf16.msra.mxu1 %v3474_v2 }
 0x621   :  { %3230 = vmatprep.subr.bf16.mxu1 %v3617_v18 }
 0x624   :  { %3231 = vmatpush3.bf16.msra.mxu1 %v3475_v5 }
 0x625   :  { %3232 = vmatprep.subr.bf16.mxu1 %v3617_v18 }
 0x628   :  { %3233 = vmatpush3.bf16.msra.mxu1 %v3476_v6 }
 0x629   :  { %3234 = vmatprep.subr.bf16.mxu1 %v3617_v18 }
 0x62c   :  { %3235 = vmatpush3.bf16.msra.mxu1 %v3477_v7 }
 0x62d   :  { %3236 = vmatprep.subr.bf16.mxu1 %v3617_v18 }
 0x630   :  { %3237 = vmatpush3.bf16.msra.mxu1 %v3478_v8 }
 0x631   :  { %3268 = vmatprep.subr.bf16.mxu1 %v3617_v18 }
 0x6e6   :  { %v1141_v10 = vpop.f32.mrb[36].mxu1 }
 0x6e7   :  { %v1148_v31 = vadd.f32 %v1141_v10, %v3709_v3  ;;  %v3212_v32 = vpop.f32.mrb[37].mxu1 }
 0x6e8   :  { %v1144_v33 = vpop.f32.mrb[38].mxu1 }
 0x6e9   :  { %v3953_v35 = vadd.f32 %v2904_v30, %v1148_v31  ;;  %v1149_v36 = vadd.f32 %v1144_v33, %v3711_v4  ;;  %v3213_v58 = vpop.f32.mrb[39].mxu1  ;;  %v2919_v31 = vld [vmem:[%s4363_s10] ss:$0 sm:$0xff] }
 0x6eb   :  { %v3956_v37 = vadd.f32 %v2904_v30, %v1149_v36  ;;  %v1159_v34 = vsel %vm57_vm0, %v3953_v35, 0.0 }
 0x6ec   :  { %1160 = vadd.xlane.f32.xlu1 %v1159_v34 }
 0x6ed   :  { %v1162_v38 = vsel %vm57_vm0, %v3956_v37, 0.0 }
 0x6ee   :  { %1163 = vadd.xlane.f32.xlu0 %v1162_v38 }
 0x779   :  { %v1161_v39 = vpop.xlane.xlu1 %1160 }
 0x77a   :  { %v1165_v40 = vmul.f32 0.03125, %v1161_v39 }
 0x77b   :  { %v1164_v3 = vpop.xlane.xlu0 %1163 }
 0x77c   :  { %v1167_v41 = vsub.f32 %v3953_v35, %v1165_v40  ;;  %v1166_v42 = vmul.f32 0.03125, %v1164_v3 }
 0x77e   :  { %v1168_v43 = vsub.f32 %v3956_v37, %v1166_v42  ;;  %v1169_v4 = vmul.f32 %v1167_v41, %v1167_v41 }
 0x780   :  { %v1171_v44 = vsel %vm57_vm0, %v1169_v4, 0.0  ;;  %v1170_v45 = vmul.f32 %v1168_v43, %v1168_v43 }
 0x781   :  { %1172 = vadd.xlane.f32.xlu0 %v1171_v44 }
 0x782   :  { %v1174_v46 = vsel %vm57_vm0, %v1170_v45, 0.0 }
 0x783   :  { %1175 = vadd.xlane.f32.xlu1 %v1174_v46 }
 0x80e   :  { %v1173_v49 = vpop.xlane.xlu0 %1172 }
 0x80f   :  { %v1177_v50 = vmul.f32 0.03125, %v1173_v49  ;;  %v3480_v49 = vld [vmem:[%s4356_s3 + $0x18] sm:$0xff]  }
 0x810   :  { %v1176_v51 = vpop.xlane.xlu1 %1175 }
 0x811   :  { %v1179_v53 = vadd.f32 1e-05, %v1177_v50  ;;  %v1178_v54 = vmul.f32 0.03125, %v1176_v51 }
 0x813   :  { %3531 = vrsqrt.f32 %v1179_v53  ;;  %v1180_v55 = vadd.f32 1e-05, %v1178_v54 }
 0x815   :  { %3533 = vrsqrt.f32 %v1180_v55 }
 0x81d   :  { %v3532_v56 = vpop.eup %3531 }
 0x81e   :  { %v1183_v60 = vmul.f32 %v3532_v56, %v1167_v41 }
 0x81f   :  { %v3534_v57 = vpop.eup %3533 }
 0x820   :  { %v1184_v61 = vmul.f32 %v3534_v57, %v1168_v43 }
 0x822   :  { %v1185_v62 = vpack.c.bf16 %v1184_v61, %v1183_v60 }
 0x824   :  { %3219 = vmatmul.mubr.msk.bf16.vlgmr.msra.gmra.mrb[32].mxu0 %vm57_vm0, %v1185_v62 }
 0x825   :  { %3246 = vmatprep.mubr.msk.bf16.mxu0 %vm3618_vm1, %v3617_v18  ;;  %3243 = vmatpush3.bf16.msra.mxu0 %v3479_v48 }
 0x826   :  { %3244 = vmatprep.subr.bf16.mxu0 %v3617_v18 }
 0x829   :  { %3245 = vmatpush3.bf16.msra.mxu0 %v3480_v49 }
 0x82a   :  { %3250 = vmatprep.subr.bf16.mxu0 %v3617_v18 }
 0x8f7   :  { %v1246_v11 = vpop.f32.mrb[32].mxu0 }
 0x8f8   :  { %v1247_v12 = vadd.f32 %v2905_v9, %v1246_v11  ;;  %v3220_v14 = vpop.f32.mrb[33].mxu0 }
 0x8f9   :  { %v1249_v52 = vpop.f32.mrb[34].mxu0 }
 0x8fa   :  { %v2909_v17 = vmul.f32 -1.702, %v1247_v12  ;;  %v1250_v59 = vadd.f32 %v2905_v9, %v1249_v52  ;;  %v3221_v20 = vpop.f32.mrb[35].mxu0 }
 0x8fc   :  { %v1257_v21 = vmul.f32 1.442695, %v2909_v17  ;;  %v2910_v13 = vmul.f32 -1.702, %v1250_v59 }
 0x8fe   :  { %3535 = vpow2.f32 %v1257_v21  ;;  %v1259_v22 = vmul.f32 1.442695, %v2910_v13 }
 0x900   :  { %3537 = vpow2.f32 %v1259_v22 }
 0x908   :  { %v3536_v23 = vpop.eup %3535 }
 0x909   :  { %v1261_v24 = vadd.f32 1.0, %v3536_v23 }
 0x90a   :  { %v3538_v25 = vpop.eup %3537 }
 0x90b   :  { %3539 = vrcp.f32 %v1261_v24  ;;  %v1262_v26 = vadd.f32 1.0, %v3538_v25 }
 0x90d   :  { %3541 = vrcp.f32 %v1262_v26 }
 0x915   :  { %v3540_v27 = vpop.eup %3539 }
 0x916   :  { %v1267_v29 = vmul.f32 %v3540_v27, %v1247_v12 }
 0x917   :  { %v3542_v28 = vpop.eup %3541 }
 0x918   :  { %v1268_v16 = vmul.f32 %v3542_v28, %v1250_v59 }
 0x91a   :  { %v1269_v10 = vpack.c.bf16 %v1268_v16, %v1267_v29 }
 0x91c   :  { %3239 = vmatmul.mubr.bf16.vlgmr.msra.gmra.mrb[40].mxu1 %v1269_v10 }
 0x91d   :  { %3270 = vmatprep.mubr.msk.bf16.mxu1 %vm3618_vm1, %v3617_v18 }
 0x9ef   :  { %v1368_v30 = vpop.f32.mrb[40].mxu1 }
 0x9f0   :  { %v1375_v32 = vadd.f32 %v1368_v30, %v3953_v35  ;;  %v3240_v33 = vpop.f32.mrb[41].mxu1 }
 0x9f1   :  { %v1371_v36 = vpop.f32.mrb[42].mxu1 }
 0x9f2   :  { %v4018_v58 = vadd.f32 %v2919_v31, %v1375_v32  ;;  %v1376_v34 = vadd.f32 %v1371_v36, %v3956_v37  ;;  %v3241_v38 = vpop.f32.mrb[43].mxu1 }
 0x9f4   :  { %v4021_v39 = vadd.f32 %v2919_v31, %v1376_v34  ;;  %v1386_v40 = vsel %vm57_vm0, %v4018_v58, 0.0 }
 0x9f5   :  { %1387 = vadd.xlane.f32.xlu0 %v1386_v40 }
 0x9f6   :  { %v1389_v3 = vsel %vm57_vm0, %v4021_v39, 0.0 }
 0x9f7   :  { %1390 = vadd.xlane.f32.xlu1 %v1389_v3 }
 0xa82   :  { %v1388_v41 = vpop.xlane.xlu0 %1387 }
 0xa83   :  { %v1392_v42 = vmul.f32 0.03125, %v1388_v41 }
 0xa84   :  { %v1391_v35 = vpop.xlane.xlu1 %1390 }
 0xa85   :  { %v1394_v43 = vsub.f32 %v4018_v58, %v1392_v42  ;;  %v1393_v4 = vmul.f32 0.03125, %v1391_v35 }
 0xa87   :  { %v1395_v44 = vsub.f32 %v4021_v39, %v1393_v4  ;;  %v1396_v37 = vmul.f32 %v1394_v43, %v1394_v43 }
 0xa89   :  { %v1398_v45 = vsel %vm57_vm0, %v1396_v37, 0.0  ;;  %v1397_v46 = vmul.f32 %v1395_v44, %v1395_v44 }
 0xa8a   :  { %1399 = vadd.xlane.f32.xlu0 %v1398_v45 }
 0xa8b   :  { %v1401_v47 = vsel %vm57_vm0, %v1397_v46, 0.0 }
 0xa8c   :  { %1402 = vadd.xlane.f32.xlu1 %v1401_v47 }
 0xb17   :  { %v1400_v50 = vpop.xlane.xlu0 %1399 }
 0xb18   :  { %v1404_v51 = vmul.f32 0.03125, %v1400_v50 }
 0xb19   :  { %v1403_v53 = vpop.xlane.xlu1 %1402 }
 0xb1a   :  { %v1406_v54 = vadd.f32 1e-05, %v1404_v51  ;;  %v1405_v55 = vmul.f32 0.03125, %v1403_v53 }
 0xb1c   :  { %3543 = vrsqrt.f32 %v1406_v54  ;;  %v1407_v56 = vadd.f32 1e-05, %v1405_v55 }
 0xb1e   :  { %3545 = vrsqrt.f32 %v1407_v56 }
 0xb26   :  { %v3544_v57 = vpop.eup %3543 }
 0xb27   :  { %v1410_v61 = vmul.f32 %v3544_v57, %v1394_v43 }
 0xb28   :  { %v3546_v60 = vpop.eup %3545 }
 0xb29   :  { %v1411_v62 = vmul.f32 %v3546_v60, %v1395_v44 }
 0xb2b   :  { %v1412_v63 = vpack.c.bf16 %v1411_v62, %v1410_v61 }
 0xb2d   :  { %3247 = vmatmul.mubr.msk.bf16.vlgmr.msra.gmra.mrb[36].mxu0 %vm57_vm0, %v1412_v63 }
 0xb2e   :  { %3252 = vmatprep.mubr.msk.bf16.mxu0 %vm3618_vm1, %v3617_v18 }
 0xc00   :  { %v1475_v1 = vpop.f32.mrb[36].mxu0 }
 0xc01   :  { %v3248_v2 = vpop.f32.mrb[37].mxu0  ;;  %v1476_v6 = vadd.f32 %v2925_v0, %v1475_v1 }
 0xc02   :  { %v1478_v5 = vpop.f32.mrb[38].mxu0 }
 0xc03   :  { %v1479_v7 = vadd.f32 %v2925_v0, %v1478_v5  ;;  %v3249_v8 = vpop.f32.mrb[39].mxu0  ;;  %v1502_v12 = vpack.c.bf16 %v1476_v6, %v1476_v6 }
 0xc05   :  { %v3438_v9 = vpack.i.bf16 %v1479_v7, %v1476_v6  ;;  %v1503_v11 = vpack.c.bf16 %v1479_v7, %v1479_v7 }
 0xc07   :  { %3439 = vrot.lane.b32.xlu1 %v3438_v9, %s3619_s18  ;;  %3434 = vrot.lane.b32.xlu0 %v3438_v9, %s3620_s19 }
 0xc0b   :  { %3444 = vrot.lane.b32.xlu1 %v3438_v9, %s3621_s20  ;;  %1560 = vrot.lane.b32.xlu0 %v1503_v11, %s3622_s21 }
 0xc0f   :  { %1511 = vrot.lane.b32.xlu1 %v1502_v12, %s3622_s21 }
 0xc79   :  { %v3440_v14 = vpop.permute.xlu1 %3439  ;;  %v3435_v52 = vpop.permute.xlu0 %3434 }
 0xc7a   :  { %v3437_v17 = vunpack.i.h.bf16 %v3435_v52  ;;  %v3436_v59 = vunpack.i.l.bf16 %v3435_v52  ;;  %v3442_v20 = vunpack.i.h.bf16 %v3440_v14  ;;  %v3441_v21 = vunpack.i.l.bf16 %v3440_v14 }
 0xc7c   :  { %v1505_v13 = vpack.c.bf16 %v3437_v17, %v3437_v17  ;;  %v1504_v22 = vpack.c.bf16 %v3436_v59, %v3436_v59  ;;  %v4052_v24 = vpack.c.bf16 %v3442_v20, %v3442_v20  ;;  %v4054_v25 = vpack.c.bf16 %v3441_v21, %v3441_v21 }
 0xc7d   :  { %v3445_v23 = vpop.permute.xlu1 %3444  ;;  %v1561_v30 = vpop.permute.xlu0 %1560 }
 0xc7e   :  { %1609 = vrot.lane.b32.xlu1 %v1504_v22, %s3622_s21  ;;  %1658 = vrot.lane.b32.xlu0 %v1505_v13, %s3622_s21  ;;  %v3447_v26 = vunpack.i.h.bf16 %v3445_v23  ;;  %v3446_v27 = vunpack.i.l.bf16 %v3445_v23  ;;  %v1566_v31 = vsel %vm184_vm2, %v1561_v30, 0 }
 0xc80   :  { %v4061_v16 = vpack.c.bf16 %v3447_v26, %v3447_v26  ;;  %v4063_v10 = vpack.c.bf16 %v3446_v27, %v3446_v27 }
 0xc81   :  { %v1512_v28 = vpop.permute.xlu1 %1511 }
 0xc82   :  { %v1517_v29 = vsel %vm184_vm2, %v1512_v28, 0  ;;  %1707 = vrot.lane.b32.xlu1 %v4054_v25, %s3622_s21  ;;  %1756 = vrot.lane.b32.xlu0 %v4052_v24, %s3622_s21 }
 0xc83   :  { %3251 = vmatpush3.bf16.xpose.msra.mxu0 %v1517_v29 }
 0xc84   :  { %3256 = vmatprep.subr.bf16.mxu0 %v3617_v18 }
 0xc86   :  { %1805 = vrot.lane.b32.xlu1 %v4063_v10, %s3622_s21  ;;  %1854 = vrot.lane.b32.xlu0 %v4061_v16, %s3622_s21 }
 0xc8a   :  { %3253 = vmatmul.mubr.msk.bf16.vlgmr.msra.gmra.mrb[40].mxu0 %vm184_vm2, %v1502_v12  ;;  %1990 = vrot.lane.b32.xlu1 %v1502_v12, %s3623_s22 }
 0xc8b   :  { %2038 = vrot.lane.b32.xlu0 %v1503_v11, %s3623_s22  ;;  %3257 = vmatpush3.bf16.xpose.msra.mxu0 %v1566_v31 }
 0xc8c   :  { %3258 = vmatprep.mubr.msk.bf16.mxu0 %vm3618_vm1, %v3617_v18  ;;  %3262 = vmatprep.subr.bf16.mxu0 %v3617_v18 }
 0xc8e   :  { %2086 = vrot.lane.b32.xlu1 %v1504_v22, %s3623_s22 }
 0xc92   :  { %2134 = vrot.lane.b32.xlu1 %v1505_v13, %s3623_s22  ;;  %3259 = vmatmul.mubr.msk.bf16.vlgmr.msra.gmra.mrb[44].mxu0 %vm184_vm2, %v1503_v11 }
 0xc93   :  { %3264 = vmatprep.mubr.msk.bf16.mxu0 %vm3618_vm1, %v3617_v18 }
 0xcf0   :  { %v1610_v32 = vpop.permute.xlu1 %1609  ;;  %v1659_v33 = vpop.permute.xlu0 %1658 }
 0xcf1   :  { %v1615_v36 = vsel %vm184_vm2, %v1610_v32, 0  ;;  %v1664_v34 = vsel %vm184_vm2, %v1659_v33, 0 }
 0xcf2   :  { %3263 = vmatpush3.bf16.xpose.msra.mxu0 %v1615_v36  ;;  %3269 = vmatpush3.bf16.xpose.msra.mxu1 %v1664_v34 }
 0xcf3   :  { %3274 = vmatprep.subr.bf16.mxu0 %v3617_v18  ;;  %3280 = vmatprep.subr.bf16.mxu1 %v3617_v18 }
 0xcf4   :  { %v1708_v38 = vpop.permute.xlu1 %1707  ;;  %v1757_v40 = vpop.permute.xlu0 %1756 }
 0xcf5   :  { %v1713_v3 = vsel %vm184_vm2, %v1708_v38, 0  ;;  %v1762_v41 = vsel %vm184_vm2, %v1757_v40, 0 }
 0xcf8   :  { %v1806_v42 = vpop.permute.xlu1 %1805  ;;  %v1855_v35 = vpop.permute.xlu0 %1854 }
 0xcf9   :  { %3265 = vmatmul.mubr.msk.bf16.vlgmr.msra.gmra.mrb[48].mxu0 %vm184_vm2, %v1504_v22  ;;  %3271 = vmatmul.mubr.msk.bf16.vlgmr.msra.gmra.mrb[44].mxu1 %vm184_vm2, %v1505_v13  ;;  %v1811_v43 = vsel %vm184_vm2, %v1806_v42, 0  ;;  %v1860_v4 = vsel %vm184_vm2, %v1855_v35, 0 }
 0xcfa   :  { %3275 = vmatpush3.bf16.xpose.msra.mxu0 %v1713_v3  ;;  %3281 = vmatpush3.bf16.xpose.msra.mxu1 %v1762_v41 }
 0xcfb   :  { %3276 = vmatprep.mubr.msk.bf16.mxu0 %vm3618_vm1, %v3617_v18  ;;  %3282 = vmatprep.mubr.msk.bf16.mxu1 %vm3618_vm1, %v3617_v18 }
 0xcfc   :  { %3286 = vmatprep.subr.bf16.mxu0 %v3617_v18  ;;  %3292 = vmatprep.subr.bf16.mxu1 %v3617_v18  ;;  %v1991_v44 = vpop.permute.xlu1 %1990 }
 0xcfd   :  { %v2039_v37 = vpop.permute.xlu0 %2038  ;;  %v1996_v45 = vsel %vm667_vm3, %v1991_v44, 0 }
 0xcfe   :  { %v2044_v46 = vsel %vm667_vm3, %v2039_v37, 0 }
 0xd00   :  { %v2087_v38 = vpop.permute.xlu1 %2086 }
 0xd01   :  { %3277 = vmatmul.mubr.msk.bf16.vlgmr.msra.gmra.mrb[52].mxu0 %vm184_vm2, %v4054_v25  ;;  %3283 = vmatmul.mubr.msk.bf16.vlgmr.msra.gmra.mrb[48].mxu1 %vm184_vm2, %v4052_v24 }
 0xd02   :  { %3287 = vmatpush3.bf16.xpose.msra.mxu0 %v1811_v43  ;;  %3293 = vmatpush3.bf16.xpose.msra.mxu1 %v1860_v4 }
 0xd03   :  { %3288 = vmatprep.mubr.msk.bf16.mxu0 %vm3618_vm1, %v3617_v18  ;;  %3294 = vmatprep.mubr.msk.bf16.mxu1 %vm3618_vm1, %v3617_v18 }
 0xd04   :  { %3298 = vmatprep.subr.bf16.mxu0 %v3617_v18  ;;  %3304 = vmatprep.subr.bf16.mxu1 %v3617_v18  ;;  %v2135_v40 = vpop.permute.xlu1 %2134 }
 0xd09   :  { %3289 = vmatmul.mubr.msk.bf16.vlgmr.msra.gmra.mrb[56].mxu0 %vm184_vm2, %v4063_v10  ;;  %3295 = vmatmul.mubr.msk.bf16.vlgmr.msra.gmra.mrb[52].mxu1 %vm184_vm2, %v4061_v16 }
 0xd0a   :  { %3299 = vmatpush3.bf16.msra.mxu0 %v1996_v45  ;;  %3305 = vmatpush3.bf16.msra.mxu1 %v2044_v46  ;;  %v2092_v45 = vsel %vm667_vm3, %v2087_v38, 0 }
 0xd0b   :  { %3300 = vmatprep.mubr.msk.bf16.mxu0 %vm3618_vm1, %v3617_v18  ;;  %3310 = vmatprep.subr.bf16.mxu0 %v3617_v18 }
 0xd0c   :  { %3306 = vmatprep.mubr.msk.bf16.mxu1 %vm3618_vm1, %v3617_v18  ;;  %3316 = vmatprep.subr.bf16.mxu1 %v3617_v18 }
 0xd5d   :  { %v1553_v47 = vpop.f32.mrb[40].mxu0 }
 0xd5e   :  { %v1554_v48 = vadd.f32 %v1553_v47, %v3819_v19  ;;  %v3254_v49 = vpop.f32.mrb[41].mxu0  ;;  %v2140_v47 = vsel %vm667_vm3, %v2135_v40, 0 }
 0xd5f   :  { %v1556_v50 = vpop.f32.mrb[42].mxu0 }
 0xd60   :  { %v3255_v51 = vpop.f32.mrb[43].mxu0  ;;  %v1902_v53 = vsel %vm184_vm2, %v1554_v48, -inf }
 0xd61   :  { %1903 = vmax.xlane.f32.xlu1 %v1902_v53 }
 0xd65   :  { %v1602_v54 = vpop.f32.mrb[44].mxu0 }
 0xd66   :  { %v1603_v55 = vadd.f32 %v1602_v54, %v3819_v19  ;;  %v3260_v56 = vpop.f32.mrb[45].mxu0 }
 0xd67   :  { %v1605_v57 = vpop.f32.mrb[46].mxu0 }
 0xd68   :  { %v3261_v60 = vpop.f32.mrb[47].mxu0  ;;  %v1905_v61 = vsel %vm184_vm2, %v1603_v55, -inf }
 0xd69   :  { %1906 = vmax.xlane.f32.xlu0 %v1905_v61 }
 0xd72   :  { %2182 = vrot.lane.b32.xlu1 %v4054_v25, %s3623_s22 }
 0xdcc   :  { %v1651_v62 = vpop.f32.mrb[48].mxu0  ;;  %v1700_v63 = vpop.f32.mrb[44].mxu1 }
 0xdcd   :  { %v4127_v0 = vadd.f32 %v1651_v62, %v3819_v19  ;;  %v3266_v1 = vpop.f32.mrb[49].mxu0  ;;  %v3272_v2 = vpop.f32.mrb[45].mxu1  ;;  %v4130_v7 = vadd.f32 %v1700_v63, %v3819_v19 }
 0xdce   :  { %v1654_v5 = vpop.f32.mrb[50].mxu0  ;;  %v1703_v6 = vpop.f32.mrb[46].mxu1 }
 0xdcf   :  { %v3267_v8 = vpop.f32.mrb[51].mxu0  ;;  %v3273_v9 = vpop.f32.mrb[47].mxu1  ;;  %v1908_v11 = vsel %vm184_vm2, %v4127_v0, -inf  ;;  %v1911_v12 = vsel %vm184_vm2, %v4130_v7, -inf }
 0xdd0   :  { %1909 = vmax.xlane.f32.xlu0 %v1908_v11 }
 0xdd4   :  { %v1749_v14 = vpop.f32.mrb[52].mxu0  ;;  %1912 = vmax.xlane.f32.xlu0 %v1911_v12  ;;  %v1798_v52 = vpop.f32.mrb[48].mxu1 }
 0xdd5   :  { %v4137_v17 = vadd.f32 %v1749_v14, %v3819_v19  ;;  %v3278_v59 = vpop.f32.mrb[53].mxu0  ;;  %v3284_v20 = vpop.f32.mrb[49].mxu1 }
 0xdd6   :  { %v1752_v21 = vpop.f32.mrb[54].mxu0  ;;  %v1801_v13 = vpop.f32.mrb[50].mxu1 }
 0xdd7   :  { %v3279_v22 = vpop.f32.mrb[55].mxu0  ;;  %v3285_v23 = vpop.f32.mrb[51].mxu1  ;;  %v1914_v25 = vsel %vm184_vm2, %v4137_v17, -inf }
 0xdd8   :  { %1915 = vmax.xlane.f32.xlu1 %v1914_v25 }
 0xddc   :  { %v1847_v26 = vpop.f32.mrb[56].mxu0  ;;  %v1896_v27 = vpop.f32.mrb[52].mxu1 }
 0xddd   :  { %v4142_v28 = vadd.f32 %v1847_v26, %v3819_v19  ;;  %v3290_v29 = vpop.f32.mrb[57].mxu0  ;;  %v3296_v30 = vpop.f32.mrb[53].mxu1 }
 0xdde   :  { %v1850_v31 = vpop.f32.mrb[58].mxu0  ;;  %v1899_v32 = vpop.f32.mrb[54].mxu1 }
 0xddf   :  { %v3291_v33 = vpop.f32.mrb[59].mxu0  ;;  %v3297_v36 = vpop.f32.mrb[55].mxu1  ;;  %v1920_v34 = vsel %vm184_vm2, %v4142_v28, -inf }
 0xde0   :  { %1921 = vmax.xlane.f32.xlu1 %v1920_v34 }
 0xdea   :  { %2230 = vrot.lane.b32.xlu0 %v4052_v24, %s3623_s22  ;;  %v4160_v24 = vadd.f32 %v1798_v52, %v3819_v19 }
 0xdec   :  { %v1917_v49 = vsel %vm184_vm2, %v4160_v24, -inf }
 0xdee   :  { %v1904_v3 = vpop.xlane.xlu1 %1903 }
 0xdef   :  { %v1926_v41 = vsub.f32 %v1554_v48, %v1904_v3  ;;  %v4168_v48 = vadd.f32 %v1896_v27, %v3819_v19 }
 0xdf1   :  { %v1934_v42 = vmul.f32 1.442695, %v1926_v41  ;;  %2278 = vrot.lane.b32.xlu1 %v4063_v10, %s3623_s22  ;;  %v1923_v50 = vsel %vm184_vm2, %v4168_v48, -inf }
 0xdf2   :  { %v2183_v54 = vpop.permute.xlu1 %2182 }
 0xdf3   :  { %3547 = vpow2.f32 %v1934_v42  ;;  %v2188_v5 = vsel %vm667_vm3, %v2183_v54, 0 }
 0xdf6   :  { %v1907_v35 = vpop.xlane.xlu0 %1906 }
 0xdf7   :  { %v1927_v43 = vsub.f32 %v1603_v55, %v1907_v35 }
 0xdf9   :  { %v1936_v4 = vmul.f32 1.442695, %v1927_v43 }
 0xdfb   :  { %3549 = vpow2.f32 %v1936_v4 }
 0xdfd   :  { %v4150_v44 = vpop.eup %3547 }
 0xdfe   :  { %v1982_v37 = vpack.c.bf16 %v4150_v44, %v4150_v44  ;;  %v1950_v23 = vsel %vm184_vm2, %v4150_v44, 0.0 }
 0xe00   :  { %3301 = vmatmul.mubr.msk.bf16.vlgmr.msra.gmra.mrb[60].mxu0 %vm184_vm2, %v1982_v37 }
 0xe01   :  { %3311 = vmatpush3.bf16.msra.mxu0 %v2092_v45  ;;  %3312 = vmatprep.mubr.msk.bf16.mxu0 %vm3618_vm1, %v3617_v18 }
 0xe02   :  { %3322 = vmatprep.subr.bf16.mxu0 %v3617_v18 }
 0xe05   :  { %v4162_v10 = vpop.eup %3549 }
 0xe06   :  { %v1983_v46 = vpack.c.bf16 %v4162_v10, %v4162_v10  ;;  %v1953_v3 = vsel %vm184_vm2, %v4162_v10, 0.0 }
 0xe08   :  { %3307 = vmatmul.mubr.msk.bf16.vlgmr.msra.gmra.mrb[56].mxu1 %vm184_vm2, %v1983_v46 }
 0xe09   :  { %3317 = vmatpush3.bf16.msra.mxu1 %v2140_v47  ;;  %1918 = vmax.xlane.f32.xlu0 %v1917_v49 }
 0xe0a   :  { %3318 = vmatprep.mubr.msk.bf16.mxu1 %vm3618_vm1, %v3617_v18  ;;  %3328 = vmatprep.subr.bf16.mxu1 %v3617_v18 }
 0xe0d   :  { %1924 = vmax.xlane.f32.xlu0 %v1923_v50 }
 0xe23   :  { %2326 = vrot.lane.b32.xlu0 %v4061_v16, %s3623_s22 }
 0xe5d   :  { %v1910_v19 = vpop.xlane.xlu0 %1909 }
 0xe5e   :  { %v1928_v51 = vsub.f32 %v4127_v0, %v1910_v19 }
 0xe60   :  { %v1938_v53 = vmul.f32 1.442695, %v1928_v51 }
 0xe61   :  { %v1913_v55 = vpop.xlane.xlu0 %1912 }
 0xe62   :  { %3551 = vpow2.f32 %v1938_v53  ;;  %v1929_v56 = vsub.f32 %v4130_v7, %v1913_v55 }
 0xe64   :  { %v1940_v57 = vmul.f32 1.442695, %v1929_v56 }
 0xe65   :  { %v1916_v60 = vpop.xlane.xlu1 %1915  ;;  %v2231_v7 = vpop.permute.xlu0 %2230 }
 0xe66   :  { %3553 = vpow2.f32 %v1940_v57  ;;  %v1930_v61 = vsub.f32 %v4137_v17, %v1916_v60  ;;  %v2236_v12 = vsel %vm667_vm3, %v2231_v7, 0 }
 0xe68   :  { %v1942_v62 = vmul.f32 1.442695, %v1930_v61 }
 0xe6a   :  { %3555 = vpow2.f32 %v1942_v62 }
 0xe6c   :  { %v3552_v63 = vpop.eup %3551 }
 0xe6d   :  { %v1922_v1 = vpop.xlane.xlu1 %1921  ;;  %v1956_v16 = vsel %vm184_vm2, %v3552_v63, 0.0  ;;  %v1984_v2 = vpack.c.bf16 %v3552_v63, %v3552_v63 }
 0xe6e   :  { %v1932_v0 = vsub.f32 %v4142_v28, %v1922_v1  ;;  %1957 = vadd.xlane.f32.xlu1 %v1956_v16 }
 0xe6f   :  { %3313 = vmatmul.mubr.msk.bf16.vlgmr.msra.gmra.mrb[64].mxu0 %vm184_vm2, %v1984_v2 }
 0xe70   :  { %v3554_v6 = vpop.eup %3553  ;;  %v1946_v8 = vmul.f32 1.442695, %v1932_v0  ;;  %3323 = vmatpush3.bf16.msra.mxu0 %v2188_v5  ;;  %3324 = vmatprep.mubr.msk.bf16.mxu0 %vm3618_vm1, %v3617_v18 }
 0xe71   :  { %v1959_v9 = vsel %vm184_vm2, %v3554_v6, 0.0  ;;  %v1985_v11 = vpack.c.bf16 %v3554_v6, %v3554_v6  ;;  %3334 = vmatprep.subr.bf16.mxu0 %v3617_v18  ;;  %v2279_v52 = vpop.permute.xlu1 %2278 }
 0xe72   :  { %3557 = vpow2.f32 %v1946_v8  ;;  %1960 = vadd.xlane.f32.xlu0 %v1959_v9  ;;  %v2284_v20 = vsel %vm667_vm3, %v2279_v52, 0 }
 0xe73   :  { %3319 = vmatmul.mubr.msk.bf16.vlgmr.msra.gmra.mrb[60].mxu1 %vm184_vm2, %v1985_v11  ;;  %v3481_v11 = vld [vmem:[%s4358_s5 + $0x10] sm:$0xff]  }
 0xe74   :  { %v3556_v14 = vpop.eup %3555  ;;  %3329 = vmatpush3.bf16.msra.mxu1 %v2236_v12  ;;  %3330 = vmatprep.mubr.msk.bf16.mxu1 %vm3618_vm1, %v3617_v18 }
 0xe75   :  { %v1962_v17 = vsel %vm184_vm2, %v3556_v14, 0.0  ;;  %v1986_v59 = vpack.c.bf16 %v3556_v14, %v3556_v14  ;;  %3340 = vmatprep.subr.bf16.mxu1 %v3617_v18 }
 0xe76   :  { %1963 = vadd.xlane.f32.xlu0 %v1962_v17 }
 0xe77   :  { %3325 = vmatmul.mubr.msk.bf16.vlgmr.msra.gmra.mrb[68].mxu0 %vm184_vm2, %v1986_v59 }
 0xe78   :  { %3335 = vmatpush3.bf16.msra.mxu0 %v2284_v20  ;;  %3336 = vmatprep.mubr.msk.bf16.mxu0 %vm3618_vm1, %v3617_v18 }
 0xe79   :  { %3346 = vmatprep.subr.bf16.mxu0 %v3617_v18 }
 0xe7c   :  { %v3558_v21 = vpop.eup %3557 }
 0xe7d   :  { %v1968_v13 = vsel %vm184_vm2, %v3558_v21, 0.0  ;;  %v1988_v22 = vpack.c.bf16 %v3558_v21, %v3558_v21 }
 0xe7e   :  { %1969 = vadd.xlane.f32.xlu1 %v1968_v13 }
 0xe7f   :  { %3337 = vmatmul.mubr.msk.bf16.vlgmr.msra.gmra.mrb[72].mxu0 %vm184_vm2, %v1988_v22  ;;  %v3482_v22 = vld [vmem:[%s4358_s5 + $0x18] sm:$0xff]  }
 0xe80   :  { %3350 = vmatprep.mubr.msk.bf16.mxu0 %vm3618_vm1, %v3617_v18  ;;  %3347 = vmatpush3.bf16.msra.mxu0 %v3481_v11 }
 0xe81   :  { %3348 = vmatprep.subr.bf16.mxu0 %v3617_v18 }
 0xe82   :  { %1951 = vadd.xlane.f32.xlu1 %v1950_v23 }
 0xe84   :  { %3349 = vmatpush3.bf16.msra.mxu0 %v3482_v22 }
 0xe85   :  { %3362 = vmatprep.subr.bf16.mxu0 %v3617_v18 }
 0xe96   :  { %v1919_v25 = vpop.xlane.xlu0 %1918 }
 0xe97   :  { %v1931_v26 = vsub.f32 %v4160_v24, %v1919_v25 }
 0xe99   :  { %v1944_v27 = vmul.f32 1.442695, %v1931_v26 }
 0xe9a   :  { %v1925_v28 = vpop.xlane.xlu0 %1924 }
 0xe9b   :  { %3559 = vpow2.f32 %v1944_v27  ;;  %v1933_v29 = vsub.f32 %v4168_v48, %v1925_v28 }
 0xe9d   :  { %v1948_v30 = vmul.f32 1.442695, %v1933_v29 }
 0xe9e   :  { %v2327_v32 = vpop.permute.xlu0 %2326 }
 0xe9f   :  { %3561 = vpow2.f32 %v1948_v30  ;;  %v2332_v34 = vsel %vm667_vm3, %v2327_v32, 0 }
 0xea5   :  { %v3560_v31 = vpop.eup %3559 }
 0xea6   :  { %v1965_v33 = vsel %vm184_vm2, %v3560_v31, 0.0  ;;  %v1987_v36 = vpack.c.bf16 %v3560_v31, %v3560_v31 }
 0xea7   :  { %1966 = vadd.xlane.f32.xlu0 %v1965_v33 }
 0xea8   :  { %3331 = vmatmul.mubr.msk.bf16.vlgmr.msra.gmra.mrb[64].mxu1 %vm184_vm2, %v1987_v36 }
 0xea9   :  { %v3562_v38 = vpop.eup %3561  ;;  %3341 = vmatpush3.bf16.msra.mxu1 %v2332_v34  ;;  %3342 = vmatprep.mubr.msk.bf16.mxu1 %vm3618_vm1, %v3617_v18 }
 0xeaa   :  { %v1971_v40 = vsel %vm184_vm2, %v3562_v38, 0.0  ;;  %3354 = vmatprep.subr.bf16.mxu1 %v3617_v18  ;;  %v1989_v41 = vpack.c.bf16 %v3562_v38, %v3562_v38 }
 0xeab   :  { %1972 = vadd.xlane.f32.xlu0 %v1971_v40 }
 0xeaf   :  { %1954 = vadd.xlane.f32.xlu0 %v1953_v3 }
 0xeb0   :  { %3343 = vmatmul.mubr.msk.bf16.vlgmr.msra.gmra.mrb[68].mxu1 %vm184_vm2, %v1989_v41 }
 0xeb1   :  { %3358 = vmatprep.mubr.msk.bf16.mxu1 %vm3618_vm1, %v3617_v18 }
 0xed3   :  { %v4222_v42 = vpop.f32.mrb[60].mxu0 }
 0xed4   :  { %v3302_v35 = vpop.f32.mrb[61].mxu0 }
 0xed5   :  { %v2035_v43 = vpop.f32.mrb[62].mxu0 }
 0xed6   :  { %v3303_v4 = vpop.f32.mrb[63].mxu0 }
 0xedb   :  { %v4224_v44 = vpop.f32.mrb[56].mxu1 }
 0xedc   :  { %v3308_v37 = vpop.f32.mrb[57].mxu1 }
 0xedd   :  { %v2083_v45 = vpop.f32.mrb[58].mxu1 }
 0xede   :  { %v3309_v24 = vpop.f32.mrb[59].mxu1 }
 0xefb   :  { %v1958_v46 = vpop.xlane.xlu1 %1957 }
 0xefc   :  { %3563 = vrcp.f32 %v1958_v46 }
 0xeff   :  { %v1961_v47 = vpop.xlane.xlu0 %1960 }
 0xf00   :  { %3565 = vrcp.f32 %v1961_v47 }
 0xf03   :  { %v1964_v7 = vpop.xlane.xlu0 %1963 }
 0xf04   :  { %3567 = vrcp.f32 %v1964_v7 }
 0xf06   :  { %v3564_v50 = vpop.eup %3563 }
 0xf0a   :  { %v3566_v51 = vpop.eup %3565 }
 0xf0b   :  { %v1970_v9 = vpop.xlane.xlu1 %1969 }
 0xf0e   :  { %v3568_v14 = vpop.eup %3567 }
 0xf0f   :  { %v1952_v34 = vpop.xlane.xlu1 %1951 }
 0xf34   :  { %v1967_v8 = vpop.xlane.xlu0 %1966 }
 0xf35   :  { %3569 = vrcp.f32 %v1967_v8 }
 0xf36   :  { %3571 = vrcp.f32 %v1970_v9 }
 0xf38   :  { %v1973_v12 = vpop.xlane.xlu0 %1972 }
 0xf39   :  { %3573 = vrcp.f32 %v1973_v12 }
 0xf3a   :  { %3575 = vrcp.f32 %v1952_v34  ;;  %v3491_v34 = vld [vmem:[%s4362_s9 + $0x70] sm:$0xff]  }
 0xf3c   :  { %v1955_v38 = vpop.xlane.xlu0 %1954 }
 0xf3d   :  { %3577 = vrcp.f32 %v1955_v38  ;;  %v3492_v38 = vld [vmem:[%s4362_s9 + $0x78] sm:$0xff]  }
 0xf3f   :  { %v3570_v52 = vpop.eup %3569 }
 0xf40   :  { %v3572_v26 = vpop.eup %3571 }
 0xf42   :  { %v2128_v10 = vpop.f32.mrb[64].mxu0 }
 0xf43   :  { %v3314_v48 = vpop.f32.mrb[65].mxu0  ;;  %v2376_v54 = vmul.f32 %v3564_v50, %v2128_v10  ;;  %v3574_v27 = vpop.eup %3573 }
 0xf44   :  { %v2131_v49 = vpop.f32.mrb[66].mxu0  ;;  %v3576_v3 = vpop.eup %3575 }
 0xf45   :  { %v3315_v19 = vpop.f32.mrb[67].mxu0  ;;  %v2374_v24 = vmul.f32 %v3576_v3, %v4222_v42  ;;  %v2992_v3 = vld [vmem:[%s4353_s0 + $0x1] ss:$0 sm:$0xff] }
 0xf46   :  { %v2176_v53 = vpop.f32.mrb[60].mxu1 }
 0xf47   :  { %v2377_v55 = vmul.f32 %v3566_v51, %v2176_v53  ;;  %v3320_v56 = vpop.f32.mrb[61].mxu1  ;;  %v3578_v35 = vpop.eup %3577 }
 0xf48   :  { %v2179_v57 = vpop.f32.mrb[62].mxu1  ;;  %v2375_v46 = vmul.f32 %v3578_v35, %v4224_v44  ;;  %v2953_v44 = vld [vmem:[%s4359_s6 + $0x1] ss:$0 sm:$0xff] }
 0xf49   :  { %v3448_v60 = vpack.i.bf16 %v2377_v55, %v2376_v54  ;;  %v3321_v61 = vpop.f32.mrb[63].mxu1  ;;  %v2959_v35 = vld [vmem:[%s4361_s8 + $0x1] ss:$0 sm:$0xff] }
 0xf4a   :  { %v2224_v62 = vpop.f32.mrb[68].mxu0 }
 0xf4b   :  { %v3326_v63 = vpop.f32.mrb[69].mxu0  ;;  %3449 = vrot.lane.b32.xlu1 %v3448_v60, %s3625_s23  ;;  %v2378_v59 = vmul.f32 %v3568_v14, %v2224_v62  ;;  %v3483_v14 = vld [vmem:[%s4360_s7 + $0x10] sm:$0xff]  }
 0xf4c   :  { %v2227_v1 = vpop.f32.mrb[70].mxu0  ;;  %3355 = vmatpush3.bf16.msra.mxu1 %v3483_v14 }
 0xf4d   :  { %v3327_v16 = vpop.f32.mrb[71].mxu0  ;;  %3356 = vmatprep.subr.bf16.mxu1 %v3617_v18 }
 0xf52   :  { %v2320_v2 = vpop.f32.mrb[72].mxu0 }
 0xf53   :  { %v3338_v0 = vpop.f32.mrb[73].mxu0  ;;  %v2380_v29 = vmul.f32 %v3572_v26, %v2320_v2 }
 0xf54   :  { %v2323_v5 = vpop.f32.mrb[74].mxu0 }
 0xf55   :  { %v3339_v6 = vpop.f32.mrb[75].mxu0 }
 0xf7b   :  { %v2272_v17 = vpop.f32.mrb[64].mxu1 }
 0xf7c   :  { %v2379_v20 = vmul.f32 %v3570_v52, %v2272_v17  ;;  %v3332_v21 = vpop.f32.mrb[65].mxu1  ;;  %v3484_v52 = vld [vmem:[%s4360_s7 + $0x18] sm:$0xff]  }
 0xf7d   :  { %v2275_v13 = vpop.f32.mrb[66].mxu1  ;;  %3357 = vmatpush3.bf16.msra.mxu1 %v3484_v52 }
 0xf7e   :  { %v3453_v23 = vpack.i.bf16 %v2379_v20, %v2378_v59  ;;  %v3333_v25 = vpop.f32.mrb[67].mxu1  ;;  %3382 = vmatprep.subr.bf16.mxu1 %v3617_v18 }
 0xf80   :  { %3454 = vrot.lane.b32.xlu0 %v3453_v23, %s3626_s28 }
 0xf83   :  { %v2368_v28 = vpop.f32.mrb[68].mxu1 }
 0xf84   :  { %v2381_v30 = vmul.f32 %v3574_v27, %v2368_v28  ;;  %v3344_v31 = vpop.f32.mrb[69].mxu1 }
 0xf85   :  { %v2371_v32 = vpop.f32.mrb[70].mxu1  ;;  %v3487_v31 = vld [vmem:[%s4362_s9 + $0x50] sm:$0xff]  }
 0xf86   :  { %v3458_v33 = vpack.i.bf16 %v2381_v30, %v2380_v29  ;;  %v3345_v36 = vpop.f32.mrb[71].mxu1  ;;  %v3485_v29 = vld [vmem:[%s4362_s9 + $0x40] sm:$0xff]   ;;  %v3486_v30 = vld [vmem:[%s4362_s9 + $0x48] sm:$0xff]   ;;  %v3488_v32 = vld [vmem:[%s4362_s9 + $0x58] sm:$0xff]  }
 0xf87   :  { %v3490_v36 = vld [vmem:[%s4362_s9 + $0x68] sm:$0xff]  }
 0xf88   :  { %3459 = vrot.lane.b32.xlu1 %v3458_v33, %s3627_s29  ;;  %v3489_v33 = vld [vmem:[%s4362_s9 + $0x60] sm:$0xff]   ;;  %s3629_s29 = smov [#allocation2]  }
 0xf89   :  { %s2873_s26 = sshll.u32 %s3629_s29, 4  ;;  %s2874_s26 = int_to_ptr.vmem [resolvable:$true] %s2873_s26 }
 0xf8a   :  { %s3593_s27 = scalar_lea.vmem %s2874_s26, 32  ;;  %p3598_p1 = scmp.lt.s32.totalorder %s2874_s26, %s2874_s26 }
 0xf8b   :  { %p3594_p0 = scmp.ne.s32.totalorder %s2874_s26, %s3593_s27  ;;  %p3599_p2 = scmp.lt.s32.totalorder %s3593_s27, %s3593_s27 }
 0xf8d   :  { %p3600_p3 = por %p3599_p2, %p3598_p1 }
 0xf8f   :  { %p3601_p4 = pnand %p3600_p3, %p3594_p0 }
 0xfbd   :  { %v3450_v40 = vpop.permute.xlu1 %3449 }
 0xfbe   :  { %v3452_v43 = vunpack.i.h.bf16 %v3450_v40  ;;  %v3451_v4 = vunpack.i.l.bf16 %v3450_v40  ;;  %v2991_v40 = vld [vmem:[%s4353_s0] ss:$0 sm:$0xff] }
 0xfc0   :  { %v2407_v10 = vsel %vm184_vm2, %v2375_v46, %v3452_v43  ;;  %v2406_v48 = vsel %vm184_vm2, %v2374_v24, %v3451_v4 }
 0xff2   :  { %v3455_v41 = vpop.permute.xlu0 %3454 }
 0xff3   :  { %v3457_v37 = vunpack.i.h.bf16 %v3455_v41  ;;  %v3456_v45 = vunpack.i.l.bf16 %v3455_v41  ;;  %v3628_v41 = vmov 0  }
 0xff4   :  { %3463 = vset.pattern.permute.xlu0 %v3628_v41  ;;  %3464 = vset.pattern.permute.xlu1 %v3628_v41  ;;  %v3494_v41 = vld [vmem:[%s4364_s11 + $0x8] sm:$0xff]  }
 0xff5   :  { %v2409_v19 = vsel %vm1081_vm5, %v2407_v10, %v3457_v37  ;;  %v2408_v51 = vsel %vm1081_vm5, %v2406_v48, %v3456_v45 }
 0xffa   :  { %v3460_v47 = vpop.permute.xlu1 %3459 }
 0xffb   :  { %v3462_v49 = vunpack.i.h.bf16 %v3460_v47  ;;  %v3461_v50 = vunpack.i.l.bf16 %v3460_v47 }
 0xffd   :  { %v2411_v53 = vsel %vm1084_vm6, %v2409_v19, %v3462_v49  ;;  %v2410_v54 = vsel %vm1084_vm6, %v2408_v51, %v3461_v50 }
 0xffe   :  { %v2412_v55 = vpack.c.bf16 %v2411_v53, %v2410_v54 }
0x1000   :  { %3351 = vmatmul.mubr.msk.bf16.vlgmr.msra.gmra.mrb[76].mxu0 %vm57_vm0, %v2412_v55 }
0x1001   :  { %3378 = vmatprep.mubr.msk.bf16.mxu0 %vm3618_vm1, %v3617_v18  ;;  %3363 = vmatpush3.bf16.msra.mxu0 %v3485_v29 }
0x1002   :  { %3364 = vmatprep.subr.bf16.mxu0 %v3617_v18 }
0x1005   :  { %3365 = vmatpush3.bf16.msra.mxu0 %v3486_v30 }
0x1006   :  { %3366 = vmatprep.subr.bf16.mxu0 %v3617_v18 }
0x1009   :  { %3367 = vmatpush3.bf16.msra.mxu0 %v3487_v31 }
0x100a   :  { %3368 = vmatprep.subr.bf16.mxu0 %v3617_v18 }
0x100d   :  { %3369 = vmatpush3.bf16.msra.mxu0 %v3488_v32 }
0x100e   :  { %3370 = vmatprep.subr.bf16.mxu0 %v3617_v18 }
0x1011   :  { %3371 = vmatpush3.bf16.msra.mxu0 %v3489_v33 }
0x1012   :  { %3372 = vmatprep.subr.bf16.mxu0 %v3617_v18 }
0x1015   :  { %3373 = vmatpush3.bf16.msra.mxu0 %v3490_v36 }
0x1016   :  { %3374 = vmatprep.subr.bf16.mxu0 %v3617_v18 }
0x1019   :  { %3375 = vmatpush3.bf16.msra.mxu0 %v3491_v34 }
0x101a   :  { %3376 = vmatprep.subr.bf16.mxu0 %v3617_v18 }
0x101d   :  { %3377 = vmatpush3.bf16.msra.mxu0 %v3492_v38 }
0x10d3   :  { %v2467_v42 = vpop.f32.mrb[76].mxu0 }
0x10d4   :  { %v2474_v56 = vadd.f32 %v2467_v42, %v4018_v58  ;;  %v3352_v57 = vpop.f32.mrb[77].mxu0 }
0x10d5   :  { %v2470_v60 = vpop.f32.mrb[78].mxu0 }
0x10d6   :  { %v4252_v61 = vadd.f32 %v2953_v44, %v2474_v56  ;;  %v2475_v62 = vadd.f32 %v2470_v60, %v4021_v39  ;;  %v3353_v63 = vpop.f32.mrb[79].mxu0 }
0x10d7   :  { %v2990_v63 = vld [vmem:[%s4363_s10 + $0x1] ss:$0 sm:$0xff] }
0x10d8   :  { %v4255_v1 = vadd.f32 %v2953_v44, %v2475_v62  ;;  %v2486_v16 = vsel %vm57_vm0, %v4252_v61, 0.0 }
0x10d9   :  { %2487 = vadd.xlane.f32.xlu1 %v2486_v16 }
0x10da   :  { %v2489_v2 = vsel %vm57_vm0, %v4255_v1, 0.0 }
0x10db   :  { %2490 = vadd.xlane.f32.xlu0 %v2489_v2 }
0x1166   :  { %v2488_v0 = vpop.xlane.xlu1 %2487 }
0x1167   :  { %v2492_v5 = vmul.f32 0.03125, %v2488_v0 }
0x1168   :  { %v2491_v58 = vpop.xlane.xlu0 %2490 }
0x1169   :  { %v2494_v6 = vsub.f32 %v4252_v61, %v2492_v5  ;;  %v2493_v7 = vmul.f32 0.03125, %v2491_v58 }
0x116b   :  { %v2495_v8 = vsub.f32 %v4255_v1, %v2493_v7  ;;  %v2496_v39 = vmul.f32 %v2494_v6, %v2494_v6 }
0x116d   :  { %v2498_v9 = vsel %vm57_vm0, %v2496_v39, 0.0  ;;  %v2497_v11 = vmul.f32 %v2495_v8, %v2495_v8 }
0x116e   :  { %2499 = vadd.xlane.f32.xlu0 %v2498_v9 }
0x116f   :  { %v2501_v12 = vsel %vm57_vm0, %v2497_v11, 0.0 }
0x1170   :  { %2502 = vadd.xlane.f32.xlu1 %v2501_v12 }
0x1181   :  { %2731 = vperm.xlu1 %3464, %v2992_v3   ;;  %v3493_v3 = vld [vmem:[%s4364_s11] sm:$0xff]  }
0x1184   :  { %2728 = vperm.xlu0 %3463, %v2991_v40  }
0x11fb   :  { %v2500_v17 = vpop.xlane.xlu0 %2499 }
0x11fc   :  { %v2504_v59 = vmul.f32 0.03125, %v2500_v17 }
0x11fd   :  { %v2503_v20 = vpop.xlane.xlu1 %2502 }
0x11fe   :  { %v2506_v21 = vadd.f32 1e-05, %v2504_v59  ;;  %v2505_v13 = vmul.f32 0.03125, %v2503_v20 }
0x1200   :  { %3579 = vrsqrt.f32 %v2506_v21  ;;  %v2507_v22 = vadd.f32 1e-05, %v2505_v13 }
0x1201   :  { %v2732_v60 = vpop.permute.xlu1 %2731 }
0x1202   :  { %3581 = vrsqrt.f32 %v2507_v22  ;;  %vm2734_vm8 = vcmp.eq.s32.totalorder %v3816_v15, %v2732_v60 }
0x1203   :  { %v2729_v57 = vpop.permute.xlu0 %2728 }
0x1204   :  { %vm2733_vm7 = vcmp.eq.s32.totalorder %v3816_v15, %v2729_v57 }
0x1205   :  { %v2993_v0 = vsel %vm2733_vm7, 1.0, %v3617_v18 }
0x120a   :  { %v3580_v23 = vpop.eup %3579 }
0x120b   :  { %v2510_v26 = vmul.f32 %v3580_v23, %v2494_v6 }
0x120c   :  { %v3582_v25 = vpop.eup %3581 }
0x120d   :  { %v2511_v27 = vmul.f32 %v3582_v25, %v2495_v8  ;;  %v2994_v8 = vsel %vm2734_vm8, 1.0, %v3617_v18 }
0x120f   :  { %v2512_v28 = vpack.c.bf16 %v2511_v27, %v2510_v26 }
0x1211   :  { %3359 = vmatmul.mubr.msk.bf16.vlgmr.msra.gmra.mrb[72].mxu1 %vm57_vm0, %v2512_v28 }
0x1212   :  { %3386 = vmatprep.mubr.msk.bf16.mxu1 %vm3618_vm1, %v3617_v18  ;;  %3383 = vmatpush3.bf16.msra.mxu1 %v3493_v3 }
0x1213   :  { %3384 = vmatprep.subr.bf16.mxu1 %v3617_v18  ;;  %v2995_v18 = vld [vmem:[%s4365_s12] ss:$0 sm:$0xff] }
0x1216   :  { %3385 = vmatpush3.bf16.msra.mxu1 %v3494_v41 }
0x12e4   :  { %v2575_v43 = vpop.f32.mrb[72].mxu1 }
0x12e5   :  { %v2576_v4 = vadd.f32 %v2959_v35, %v2575_v43  ;;  %v3360_v37 = vpop.f32.mrb[73].mxu1 }
0x12e6   :  { %v2578_v45 = vpop.f32.mrb[74].mxu1 }
0x12e7   :  { %v2963_v24 = vmul.f32 -1.702, %v2576_v4  ;;  %v2579_v46 = vadd.f32 %v2959_v35, %v2578_v45  ;;  %v3361_v47 = vpop.f32.mrb[75].mxu1 }
0x12e9   :  { %v2586_v10 = vmul.f32 1.442695, %v2963_v24  ;;  %v2964_v48 = vmul.f32 -1.702, %v2579_v46 }
0x12eb   :  { %3583 = vpow2.f32 %v2586_v10  ;;  %v2588_v49 = vmul.f32 1.442695, %v2964_v48 }
0x12ed   :  { %3585 = vpow2.f32 %v2588_v49 }
0x12f5   :  { %v3584_v50 = vpop.eup %3583 }
0x12f6   :  { %v2590_v19 = vadd.f32 1.0, %v3584_v50 }
0x12f7   :  { %v3586_v51 = vpop.eup %3585 }
0x12f8   :  { %3587 = vrcp.f32 %v2590_v19  ;;  %v2591_v53 = vadd.f32 1.0, %v3586_v51 }
0x12fa   :  { %3589 = vrcp.f32 %v2591_v53 }
0x1302   :  { %v3588_v54 = vpop.eup %3587 }
0x1303   :  { %v2596_v42 = vmul.f32 %v3588_v54, %v2576_v4 }
0x1304   :  { %v3590_v55 = vpop.eup %3589 }
0x1305   :  { %v2597_v44 = vmul.f32 %v3590_v55, %v2579_v46 }
0x1307   :  { %v2598_v56 = vpack.c.bf16 %v2597_v44, %v2596_v42 }
0x1309   :  { %3379 = vmatmul.mubr.bf16.vlgmr.msra.gmra.mrb[80].mxu0 %v2598_v56 }
0x13dc   :  { %v2698_v62 = vpop.f32.mrb[80].mxu0 }
0x13dd   :  { %v2705_v16 = vadd.f32 %v2698_v62, %v4252_v61  ;;  %v3380_v2 = vpop.f32.mrb[81].mxu0 }
0x13de   :  { %v2701_v5 = vpop.f32.mrb[82].mxu0 }
0x13df   :  { %v2715_v58 = vadd.f32 %v2990_v63, %v2705_v16  ;;  %v2706_v6 = vadd.f32 %v2701_v5, %v4255_v1  ;;  %v3381_v7 = vpop.f32.mrb[83].mxu0 }
0x13e1   :  { %v2739_v39 = vmul.f32 %v2993_v0, %v2715_v58  ;;  %v2716_v9 = vadd.f32 %v2990_v63, %v2706_v6 }
0x13e3   :  { %v2741_v11 = vsel %vm57_vm0, %v2739_v39, 0.0  ;;  %v2740_v12 = vmul.f32 %v2994_v8, %v2716_v9 }
0x13e4   :  { %v2742_v14 = vrot.slane %v2741_v11, 4 }
0x13e5   :  { %v2748_v61 = vsel %vm57_vm0, %v2740_v12, 0.0 }
0x13e6   :  { %v2743_v52 = vadd.f32 %v2742_v14, %v2741_v11  ;;  %v2749_v17 = vrot.slane %v2748_v61, 4 }
0x13e8   :  { %v2744_v15 = vrot.slane %v2743_v52, 2  ;;  %v2750_v59 = vadd.f32 %v2749_v17, %v2748_v61 }
0x13ea   :  { %v2745_v20 = vadd.f32 %v2744_v15, %v2743_v52  ;;  %v2751_v21 = vrot.slane %v2750_v59, 2 }
0x13ec   :  { %v2752_v13 = vadd.f32 %v2751_v21, %v2750_v59  ;;  %v2746_v22 = vrot.slane %v2745_v20, 1 }
0x13ee   :  { %v2753_v1 = vrot.slane %v2752_v13, 1  ;;  %v2747_v23 = vadd.f32 %v2746_v22, %v2745_v20 }
0x13f0   :  { %v2754_v25 = vadd.f32 %v2753_v1, %v2752_v13 }
0x13f2   :  { %v2758_v26 = vsel %vm2757_vm9, %v2754_v25, %v2747_v23 }
0x13f3   :  { %v2761_v27 = vsel %vm2760_vm10, %v2758_v26, 0.0 }
0x13f4   :  { %2762 = vadd.xlane.f32.xlu1 %v2761_v27 }
0x1481   :  { %v2763_v28 = vpop.xlane.xlu1 %2762 }
0x1482   :  { %v2764_v29 = vmul.f32 0.03125, %v2763_v28 }
0x1484   :  { %v2766_v30 = vrot.slane %v2764_v29, 1  ;;  %v2769_v31 = vsub.f32 %v2747_v23, %v2764_v29 }
0x1486   :  { %v2770_v32 = vsub.f32 %v2754_v25, %v2766_v30  ;;  %v2771_v36 = vmul.f32 %v2769_v31, %v2769_v31 }
0x1488   :  { %v2772_v33 = vmul.f32 %v2770_v32, %v2770_v32 }
0x148a   :  { %v2775_v34 = vrot.slane %v2772_v33, 7 }
0x148c   :  { %v2776_v38 = vsel %vm2757_vm9, %v2775_v34, %v2771_v36 }
0x148d   :  { %v2778_v40 = vsel %vm2760_vm10, %v2776_v38, 0.0 }
0x148e   :  { %2779 = vadd.xlane.f32.xlu0 %v2778_v40 }
0x151b   :  { %v2780_v35 = vpop.xlane.xlu0 %2779 }
0x151c   :  { %v2781_v43 = vmul.f32 0.03125, %v2780_v35 }
0x151e   :  { %v2782_v4 = vadd.f32 1e-05, %v2781_v43 }
0x1520   :  { %3591 = vrsqrt.f32 %v2782_v4 }
0x152a   :  { %v3592_v37 = vpop.eup %3591 }
0x152b   :  { %v2785_v45 = vrot.slane %v3592_v37, 1  ;;  %v2788_v24 = vmul.f32 %v3592_v37, %v2769_v31 }
0x152d   :  { %v2789_v46 = vmul.f32 %v2785_v45, %v2770_v32  ;;  %v2790_v47 = vpack.c.bf16 %v2788_v24, %v2788_v24 }
0x152f   :  { %v2791_v10 = vpack.c.bf16 %v2789_v46, %v2789_v46  ;;  %v2805_v49 = vunpack.c.l.b16 %v2790_v47 }
0x1531   :  { %v2806_v48 = vunpack.c.l.b16 %v2791_v10 }
0x1533   :  { %v2807_v50 = vrot.slane %v2806_v48, 7 }
0x1535   :  { %v2808_v19 = vsel %vm2757_vm9, %v2807_v50, %v2805_v49 }
0x1536   :  { %v2809_v51 = vpack.c.b16 %v2808_v19, %v2808_v19 }
0x1538   :  { %3387 = vmatmul.mubr.msk.bf16.vlgmr.msra.gmra.mrb[76].mxu1 %vm57_vm0, %v2809_v51 }
0x160b   :  { %v2859_v53 = vpop.f32.mrb[76].mxu1 }
0x160c   :  { %v2860_v54 = vadd.f32 %v2995_v18, %v2859_v53  ;;  %v3388_v55 = vpop.f32.mrb[77].mxu1 }
0x160d   :  { %v2862_v42 = vpop.f32.mrb[78].mxu1 }
0x160e   :  { %v3389_v44 = vpop.f32.mrb[79].mxu1  ;;  %2866 = vst.msk [vmem:[#allocation2] sm:$0x3] %vm2865_vm11, %v2860_v54 }
0x160f   :  { %3604 = shalt.err (!%p3601_p4)
}
0x1610   :  { %s3605_s12 = scalar_lea.hbm %s4366_s13, 32 }
0x1611   :  { %p3606_p5 = scmp.ne.s32.totalorder %s4366_s13, %s3605_s12  ;;  %p3609_p6 = scmp.lt.u32.totalorder %s3605_s12, %s4366_s13 }
0x1613   :  { %p3611_p7 = pnand %p3609_p6, %p3606_p5 }
0x1615   :  { %3614 = shalt.err (!%p3611_p7)
}
0x1616   :  { %2876 = dma.vmem_to_hbm [thread:$0]  %s2874_s26, 32, %s4366_s13, [#allocation3]  }
0x1617   :  { %3615 = dma.done.wait [#allocation3], 32  }
0x1618   :  { %3616 = vsyncadd [#allocation3], 4294967264 }
0x1619   :  { %2880 = vsyncpa [#allocation3], 1 }

</bundles_post_ra>
